<compile_context>
chip_gen: v5e
topology: v5e:2x2
jax: 0.10.0
libtpu: 0.0.40
codegen_flags: <defaults>
</compile_context>

<pallas_src>
import math

import jax
import jax.numpy as jnp
from jax import lax
from jax.experimental import pallas as pl
from jax.experimental.pallas import tpu as pltpu

# ---------------- small BERT config (synthetic, deterministic weights) ----------------
CFG = dict(
    vocab=100,
    hidden=32,
    heads=2,
    layers=2,
    intermediate=64,
    max_pos=16,
    num_classes=2,
    ln_eps=1e-12,
)
BATCH, SEQ = 2, 8


# ---------------- packed weight-slab layout ----------------
def slab_layout(cfg):
    """Row offsets of every parameter inside a single packed (rows, 128) f32 slab.

    All offsets are multiples of 8, so every block starts on an (8,128) tile boundary and
    the whole parameter set moves HBM->VMEM as one DMA instead of ~20 tiny ones.
    """
    H, I, L = cfg["hidden"], cfg["intermediate"], cfg["layers"]
    assert H % 8 == 0 and I % 8 == 0 and 3 * H <= 128 and I <= 128, "toy-config packing only"
    layer_stride = H + 8 + H + H + I            # wqkv | bias-block | wo | wff1 | wff2
    return dict(
        emb=0,                                  # 8 rows: [0]=emb_ln_gamma  [1]=emb_ln_beta
        layer0=8, layer_stride=layer_stride,
        wqkv=0,                                 # H rows, lanes [0:3H]  (Q cols pre-scaled)
        bvec=H,                                 # 8 rows: bqkv,bo,ln1g,ln1b,bff1,bff2,ln2g,ln2b
        wo=H + 8,                               # H rows, lanes [0:H]
        wff1=2 * H + 8,                         # H rows, lanes [0:I]
        wff2=3 * H + 8,                         # I rows, lanes [0:H]
        poolw=8 + L * layer_stride,             # H rows, lanes [0:H]
        clsw=8 + L * layer_stride + H,          # H rows, lanes [0:C]
        hbias=8 + L * layer_stride + 2 * H,     # 8 rows: [0]=pool_b  [1]=cls_b
        total=8 + L * layer_stride + 2 * H + 8,
    )


# ---------------- in-kernel helpers (traced values, stay in vregs) ----------------
def _layer_norm(x, g, b, eps):
    mu = jnp.mean(x, axis=-1, keepdims=True)
    d = x - mu
    var = jnp.mean(d * d, axis=-1, keepdims=True)
    return d * lax.rsqrt(var + eps) * g + b


def _gelu(x):
    # TODO(synk): HF BERT uses exact-erf GELU; tanh approximation used here.
    return 0.5 * x * (1.0 + jnp.tanh(0.7978845608028654 * (x + 0.044715 * x * x * x)))


# ---------------- single fused Pallas kernel for the whole forward pass ----------------
def make_fused_forward(cfg, batch, seq):
    H, nH = cfg["hidden"], cfg["heads"]
    Dh = H // nH
    L, I, C = cfg["layers"], cfg["intermediate"], cfg["num_classes"]
    eps = cfg["ln_eps"]
    B, S = batch, seq
    M, BH = B * S, B * nH
    lay = slab_layout(cfg)

    # NOTE: at real BERT sizes (H=768, I=3072, S=512) each matmul below becomes a tiled
    # (i, j, k) grid with an f32 VMEM accumulator and bf16 dot operands, and a leading
    # "parallel" grid axis would shard across the two v7x TensorCores; at this toy size a
    # single fused single-block kernel is the right shape (launch/DMA bound, not compute).
    def kernel(x_ref, mask_ref, w_ref, o_ref):
        mask = mask_ref[...]                                     # (B*nH, S, S) additive bias
        emb = w_ref[lay["emb"]:lay["emb"] + 8, :]
        h = _layer_norm(x_ref[...], emb[0:1, :H], emb[1:2, :H], eps)        # (M, H)

        for lp in range(L):                                      # layers statically unrolled
            base = lay["layer0"] + lp * lay["layer_stride"]
            bvec = w_ref[base + lay["bvec"]: base + lay["bvec"] + 8, :]     # all per-layer vectors
            wqkv = w_ref[base + lay["wqkv"]: base + lay["wqkv"] + H, :3 * H]

            # fused QKV projection; 1/sqrt(Dh) already folded into the Q columns at pack time
            qkv = jnp.dot(h, wqkv, preferred_element_type=jnp.float32) + bvec[0:1, :3 * H]

            # regroup into a (B*nH, S, Dh) batch -> 2 batched MXU calls per layer instead of
            # 2*B*nH tiny ones; no scratch stores, everything stays register-resident.
            def heads(col0):
                return jnp.concatenate(
                    [qkv[b * S:(b + 1) * S, col0 + hh * Dh: col0 + (hh + 1) * Dh][None]
                     for b in range(B) for hh in range(nH)], axis=0)        # (BH, S, Dh)

            q_h, k_h, v_h = heads(0), heads(H), heads(2 * H)

            s = jnp.einsum('nqd,nkd->nqk', q_h, k_h,
                           preferred_element_type=jnp.float32) + mask       # (BH, S, S)
            s = s - jnp.max(s, axis=-1, keepdims=True)
            e = jnp.exp(s)
            p = e / jnp.sum(e, axis=-1, keepdims=True)                       # exact softmax
            ctx = jnp.einsum('nqk,nkd->nqd', p, v_h,
                             preferred_element_type=jnp.float32)             # (BH, S, Dh)

            ctx2 = jnp.concatenate(
                [jnp.concatenate([ctx[b * nH + hh] for hh in range(nH)], axis=-1)
                 for b in range(B)], axis=0)                                  # (M, H)

            wo = w_ref[base + lay["wo"]: base + lay["wo"] + H, :H]
            attn_out = jnp.dot(ctx2, wo, preferred_element_type=jnp.float32) + bvec[1:2, :H]
            h1 = _layer_norm(h + attn_out, bvec[2:3, :H], bvec[3:4, :H], eps)

            wff1 = w_ref[base + lay["wff1"]: base + lay["wff1"] + H, :I]
            wff2 = w_ref[base + lay["wff2"]: base + lay["wff2"] + I, :H]
            ff = _gelu(jnp.dot(h1, wff1, preferred_element_type=jnp.float32) + bvec[4:5, :I])
            ff_out = jnp.dot(ff, wff2, preferred_element_type=jnp.float32) + bvec[5:6, :H]
            h = _layer_norm(h1 + ff_out, bvec[6:7, :H], bvec[7:8, :H], eps)

        # --- BERT pooler: tanh(W * h[:, 0] + b) on the [CLS] row of each sequence ---
        cls = jnp.concatenate([h[b * S: b * S + 1, :] for b in range(B)], axis=0)   # (B, H)
        hb = w_ref[lay["hbias"]: lay["hbias"] + 8, :]
        poolw = w_ref[lay["poolw"]: lay["poolw"] + H, :H]
        pooled = jnp.tanh(jnp.dot(cls, poolw, preferred_element_type=jnp.float32) + hb[0:1, :H])

        # nn.Dropout(p=0.3) is identity because the reference runs model.eval().
        clsw = w_ref[lay["clsw"]: lay["clsw"] + H, :C]
        logits = jnp.dot(pooled, clsw, preferred_element_type=jnp.float32) + hb[1:2, :C]
        o_ref[...] = logits.astype(o_ref.dtype)

    vmem = pl.BlockSpec(memory_space=pltpu.MemorySpace.VMEM)
    return pl.pallas_call(
        kernel,
        out_shape=jax.ShapeDtypeStruct((B, C), jnp.float32),
        in_specs=[vmem, vmem, vmem],
        out_specs=vmem,
    )


# ---------------- deterministic parameter construction ----------------
def init_params(key, cfg):
    H, I = cfg["hidden"], cfg["intermediate"]
    keys = iter(jax.random.split(key, 256))

    def nrm(shape):
        return (0.02 * jax.random.normal(next(keys), shape)).astype(jnp.float32)

    params = dict(
        word_emb=nrm((cfg["vocab"], H)),
        pos_emb=nrm((cfg["max_pos"], H)),
        type_emb=nrm((2, H)),
        emb_ln_g=jnp.ones((H,), jnp.float32),
        emb_ln_b=jnp.zeros((H,), jnp.float32),
        pool_w=nrm((H, H)),
        pool_b=jnp.zeros((H,), jnp.float32),
        cls_w=nrm((H, cfg["num_classes"])),
        cls_b=jnp.zeros((cfg["num_classes"],), jnp.float32),
        layers=[],
    )
    for _ in range(cfg["layers"]):
        params["layers"].append(dict(
            wq=nrm((H, H)), bq=jnp.zeros((H,), jnp.float32),
            wk=nrm((H, H)), bk=jnp.zeros((H,), jnp.float32),
            wv=nrm((H, H)), bv=jnp.zeros((H,), jnp.float32),
            wo=nrm((H, H)), bo=jnp.zeros((H,), jnp.float32),
            ln1_g=jnp.ones((H,), jnp.float32), ln1_b=jnp.zeros((H,), jnp.float32),
            w_ff1=nrm((H, I)), b_ff1=jnp.zeros((I,), jnp.float32),
            w_ff2=nrm((I, H)), b_ff2=jnp.zeros((H,), jnp.float32),
            ln2_g=jnp.ones((H,), jnp.float32), ln2_b=jnp.zeros((H,), jnp.float32),
        ))
    return params


def pack_params(params, cfg):
    """Pack every weight/bias into one lane-dense (rows, 128) f32 slab (runs once)."""
    H, I, C = cfg["hidden"], cfg["intermediate"], cfg["num_classes"]
    nH = cfg["heads"]
    Dh = H // nH
    lay = slab_layout(cfg)
    slab = jnp.zeros((lay["total"], 128), jnp.float32)

    def put(sl, r, mat):
        rows, cols = mat.shape
        return sl.at[r:r + rows, :cols].set(mat)

    slab = put(slab, lay["emb"] + 0, params["emb_ln_g"].reshape(1, H))
    slab = put(slab, lay["emb"] + 1, params["emb_ln_b"].reshape(1, H))

    scale = 1.0 / math.sqrt(Dh)                       # folded into Q weights/bias (exact)
    for l, p in enumerate(params["layers"]):
        base = lay["layer0"] + l * lay["layer_stride"]
        wqkv = jnp.concatenate([p["wq"] * scale, p["wk"], p["wv"]], axis=1)        # (H, 3H)
        bqkv = jnp.concatenate([p["bq"] * scale, p["bk"], p["bv"]]).reshape(1, 3 * H)
        slab = put(slab, base + lay["wqkv"], wqkv)
        bblock = jnp.zeros((8, 128), jnp.float32)
        bblock = bblock.at[0, :3 * H].set(bqkv[0])
        bblock = bblock.at[1, :H].set(p["bo"])
        bblock = bblock.at[2, :H].set(p["ln1_g"])
        bblock = bblock.at[3, :H].set(p["ln1_b"])
        bblock = bblock.at[4, :I].set(p["b_ff1"])
        bblock = bblock.at[5, :H].set(p["b_ff2"])
        bblock = bblock.at[6, :H].set(p["ln2_g"])
        bblock = bblock.at[7, :H].set(p["ln2_b"])
        slab = put(slab, base + lay["bvec"], bblock)
        slab = put(slab, base + lay["wo"], p["wo"])
        slab = put(slab, base + lay["wff1"], p["w_ff1"])
        slab = put(slab, base + lay["wff2"], p["w_ff2"])

    slab = put(slab, lay["poolw"], params["pool_w"])
    slab = put(slab, lay["clsw"], params["cls_w"])
    hb = jnp.zeros((8, 128), jnp.float32)
    hb = hb.at[0, :H].set(params["pool_b"])
    hb = hb.at[1, :C].set(params["cls_b"])
    slab = put(slab, lay["hbias"], hb)
    return slab


# ---------------- jitted forward (SentimentClassifier.forward, eval mode) ----------------
_FUSED_FORWARD = make_fused_forward(CFG, BATCH, SEQ)    # pallas_call built exactly once


@jax.jit
def sentiment_classifier_forward(word_emb, pos_emb, type_emb, wslab, input_ids, attention_mask):
    B, S = input_ids.shape
    H, nH = CFG["hidden"], CFG["heads"]

    # Embedding gather + sum is glue in plain JAX (token_type_ids assumed all-zero).
    emb = (word_emb[input_ids] + pos_emb[:S][None, :, :] + type_emb[0][None, None, :])
    x_emb = emb.reshape(B * S, H).astype(jnp.float32)

    # Extended attention mask pre-broadcast ONCE here (not per head/layer in the kernel).
    mask_bias = (1.0 - attention_mask.astype(jnp.float32)) * -10000.0          # (B, S)
    mask3 = jnp.broadcast_to(mask_bias[:, None, None, :],
                             (B, nH, S, S)).reshape(B * nH, S, S)

    return _FUSED_FORWARD(x_emb, mask3, wslab)                                  # (B, num_classes)


if __name__ == "__main__":
    key = jax.random.PRNGKey(0)
    k_params, k_ids = jax.random.split(key)

    params = init_params(k_params, CFG)
    wslab = pack_params(params, CFG)                    # packed once, reused every call

    input_ids = jax.random.randint(k_ids, (BATCH, SEQ), 0, CFG["vocab"], dtype=jnp.int32)
    # sample 0: full length, sample 1: last two tokens are padding
    lengths = jnp.array([[SEQ], [SEQ - 2]], dtype=jnp.int32)
    attention_mask = (jnp.arange(SEQ)[None, :] < lengths).astype(jnp.int32)     # (B, S)

    logits = sentiment_classifier_forward(params["word_emb"], params["pos_emb"],
                                          params["type_emb"], wslab,
                                          input_ids, attention_mask)
    logits = jax.block_until_ready(logits)
    # second call exercises the cached jit path (no retrace, no repack)
    logits = jax.block_until_ready(
        sentiment_classifier_forward(params["word_emb"], params["pos_emb"],
                                     params["type_emb"], wslab, input_ids, attention_mask))

    assert logits.shape == (BATCH, CFG["num_classes"])
    assert bool(jnp.all(jnp.isfinite(logits)))
    print("KERNEL_OK")
</pallas_src>

<mosaic_0001>
module attributes {stable_mosaic.version = 11 : i64} {
  func.func @kernel(%arg0: memref<16x32xf32, #tpu.memory_space<vmem>>, %arg1: memref<4x8x8xf32, #tpu.memory_space<vmem>>, %arg2: memref<416x128xf32, #tpu.memory_space<vmem>>, %arg3: memref<2x2xf32, #tpu.memory_space<vmem>>) attributes {dimension_semantics = [], scalar_prefetch = 0 : i64, scratch_operands = 0 : i64, tpu.core_type = #tpu.core_type<tc>} {
    %c0 = arith.constant 0 : index
    %c0_0 = arith.constant 0 : index
    %c0_1 = arith.constant 0 : index
    %0 = vector.load %arg1[%c0, %c0_0, %c0_1] : memref<4x8x8xf32, #tpu.memory_space<vmem>>, vector<4x8x8xf32>
    %c0_2 = arith.constant 0 : index
    %c0_3 = arith.constant 0 : index
    %1 = vector.load %arg2[%c0_2, %c0_3] : memref<416x128xf32, #tpu.memory_space<vmem>>, vector<8x128xf32>
    %c0_4 = arith.constant 0 : index
    %c0_5 = arith.constant 0 : index
    %2 = vector.load %arg0[%c0_4, %c0_5] : memref<16x32xf32, #tpu.memory_space<vmem>>, vector<16x32xf32>
    %3 = vector.extract_strided_slice %1 {offsets = [0, 0], sizes = [1, 32], strides = [1, 1]} : vector<8x128xf32> to vector<1x32xf32>
    %4 = vector.extract_strided_slice %1 {offsets = [1, 0], sizes = [1, 32], strides = [1, 1]} : vector<8x128xf32> to vector<1x32xf32>
    %cst = arith.constant dense<0.000000e+00> : vector<16xf32>
    %5 = vector.multi_reduction <add>, %2, %cst [1] : vector<16x32xf32> to vector<16xf32>
    %6 = vector.shape_cast %5 : vector<16xf32> to vector<16x1xf32>
    %cst_6 = arith.constant 3.200000e+01 : f32
    %7 = vector.broadcast %cst_6 : f32 to vector<16x1xf32>
    %8 = arith.divf %6, %7 : vector<16x1xf32>
    %9 = vector.broadcast %8 : vector<16x1xf32> to vector<16x32xf32>
    %10 = arith.subf %2, %9 : vector<16x32xf32>
    %11 = arith.mulf %10, %10 : vector<16x32xf32>
    %cst_7 = arith.constant dense<0.000000e+00> : vector<16xf32>
    %12 = vector.multi_reduction <add>, %11, %cst_7 [1] : vector<16x32xf32> to vector<16xf32>
    %13 = vector.shape_cast %12 : vector<16xf32> to vector<16x1xf32>
    %cst_8 = arith.constant 3.200000e+01 : f32
    %14 = vector.broadcast %cst_8 : f32 to vector<16x1xf32>
    %15 = arith.divf %13, %14 : vector<16x1xf32>
    %cst_9 = arith.constant 9.99999996E-13 : f32
    %16 = vector.broadcast %cst_9 : f32 to vector<16x1xf32>
    %17 = arith.addf %15, %16 : vector<16x1xf32>
    %18 = math.rsqrt %17 : vector<16x1xf32>
    %19 = vector.broadcast %18 : vector<16x1xf32> to vector<16x32xf32>
    %20 = arith.mulf %10, %19 : vector<16x32xf32>
    %21 = vector.broadcast %3 : vector<1x32xf32> to vector<16x32xf32>
    %22 = arith.mulf %20, %21 : vector<16x32xf32>
    %23 = vector.broadcast %4 : vector<1x32xf32> to vector<16x32xf32>
    %24 = arith.addf %22, %23 : vector<16x32xf32>
    %c40 = arith.constant 40 : index
    %c0_10 = arith.constant 0 : index
    %25 = vector.load %arg2[%c40, %c0_10] : memref<416x128xf32, #tpu.memory_space<vmem>>, vector<8x128xf32>
    %c8 = arith.constant 8 : index
    %c0_11 = arith.constant 0 : index
    %26 = vector.load %arg2[%c8, %c0_11] : memref<416x128xf32, #tpu.memory_space<vmem>>, vector<32x96xf32>
    %cst_12 = arith.constant dense<0.000000e+00> : vector<16x96xf32>
    %27 = tpu.matmul %24, %26, %cst_12 {dimension_numbers = #tpu.dot_dimension_numbers<[1], [0], [0], [1], [0, 0, 1, 1], [], []>} : vector<16x32xf32>, vector<32x96xf32>, vector<16x96xf32> -> vector<16x96xf32>
    %28 = vector.extract_strided_slice %25 {offsets = [0, 0], sizes = [1, 96], strides = [1, 1]} : vector<8x128xf32> to vector<1x96xf32>
    %29 = vector.broadcast %28 : vector<1x96xf32> to vector<16x96xf32>
    %30 = arith.addf %27, %29 : vector<16x96xf32>
    %31 = vector.extract_strided_slice %30 {offsets = [0, 0], sizes = [8, 16], strides = [1, 1]} : vector<16x96xf32> to vector<8x16xf32>
    %32 = vector.shape_cast %31 : vector<8x16xf32> to vector<1x8x16xf32>
    %33 = vector.extract_strided_slice %30 {offsets = [0, 16], sizes = [8, 16], strides = [1, 1]} : vector<16x96xf32> to vector<8x16xf32>
    %34 = vector.shape_cast %33 : vector<8x16xf32> to vector<1x8x16xf32>
    %35 = vector.extract_strided_slice %30 {offsets = [8, 0], sizes = [8, 16], strides = [1, 1]} : vector<16x96xf32> to vector<8x16xf32>
    %36 = vector.shape_cast %35 : vector<8x16xf32> to vector<1x8x16xf32>
    %37 = vector.extract_strided_slice %30 {offsets = [8, 16], sizes = [8, 16], strides = [1, 1]} : vector<16x96xf32> to vector<8x16xf32>
    %38 = vector.shape_cast %37 : vector<8x16xf32> to vector<1x8x16xf32>
    %39 = tpu.concatenate %32, %34, %36, %38 in 0 : vector<1x8x16xf32>, vector<1x8x16xf32>, vector<1x8x16xf32>, vector<1x8x16xf32> -> vector<4x8x16xf32>
    %40 = vector.extract_strided_slice %30 {offsets = [0, 32], sizes = [8, 16], strides = [1, 1]} : vector<16x96xf32> to vector<8x16xf32>
    %41 = vector.shape_cast %40 : vector<8x16xf32> to vector<1x8x16xf32>
    %42 = vector.extract_strided_slice %30 {offsets = [0, 48], sizes = [8, 16], strides = [1, 1]} : vector<16x96xf32> to vector<8x16xf32>
    %43 = vector.shape_cast %42 : vector<8x16xf32> to vector<1x8x16xf32>
    %44 = vector.extract_strided_slice %30 {offsets = [8, 32], sizes = [8, 16], strides = [1, 1]} : vector<16x96xf32> to vector<8x16xf32>
    %45 = vector.shape_cast %44 : vector<8x16xf32> to vector<1x8x16xf32>
    %46 = vector.extract_strided_slice %30 {offsets = [8, 48], sizes = [8, 16], strides = [1, 1]} : vector<16x96xf32> to vector<8x16xf32>
    %47 = vector.shape_cast %46 : vector<8x16xf32> to vector<1x8x16xf32>
    %48 = tpu.concatenate %41, %43, %45, %47 in 0 : vector<1x8x16xf32>, vector<1x8x16xf32>, vector<1x8x16xf32>, vector<1x8x16xf32> -> vector<4x8x16xf32>
    %49 = vector.extract_strided_slice %30 {offsets = [0, 64], sizes = [8, 16], strides = [1, 1]} : vector<16x96xf32> to vector<8x16xf32>
    %50 = vector.shape_cast %49 : vector<8x16xf32> to vector<1x8x16xf32>
    %51 = vector.extract_strided_slice %30 {offsets = [0, 80], sizes = [8, 16], strides = [1, 1]} : vector<16x96xf32> to vector<8x16xf32>
    %52 = vector.shape_cast %51 : vector<8x16xf32> to vector<1x8x16xf32>
    %53 = vector.extract_strided_slice %30 {offsets = [8, 64], sizes = [8, 16], strides = [1, 1]} : vector<16x96xf32> to vector<8x16xf32>
    %54 = vector.shape_cast %53 : vector<8x16xf32> to vector<1x8x16xf32>
    %55 = vector.extract_strided_slice %30 {offsets = [8, 80], sizes = [8, 16], strides = [1, 1]} : vector<16x96xf32> to vector<8x16xf32>
    %56 = vector.shape_cast %55 : vector<8x16xf32> to vector<1x8x16xf32>
    %57 = tpu.concatenate %50, %52, %54, %56 in 0 : vector<1x8x16xf32>, vector<1x8x16xf32>, vector<1x8x16xf32>, vector<1x8x16xf32> -> vector<4x8x16xf32>
    "tpu.trace_start"() <{level = 10 : i32, message = "nqd,nkd->nqk"}> : () -> ()
    %cst_13 = arith.constant dense<0.000000e+00> : vector<4x8x8xf32>
    %58 = tpu.matmul %39, %48, %cst_13 {dimension_numbers = #tpu.dot_dimension_numbers<[2], [2], [1], [1], [0, 0, 0, 1, 1, 1], [0], [0]>} : vector<4x8x16xf32>, vector<4x8x16xf32>, vector<4x8x8xf32> -> vector<4x8x8xf32>
    "tpu.trace_stop"() : () -> ()
    %59 = arith.addf %58, %0 : vector<4x8x8xf32>
    %cst_14 = arith.constant dense<0xFF800000> : vector<4x8xf32>
    %60 = vector.multi_reduction <maximumf>, %59, %cst_14 [2] : vector<4x8x8xf32> to vector<4x8xf32>
    %61 = vector.shape_cast %60 : vector<4x8xf32> to vector<4x8x1xf32>
    %62 = vector.broadcast %61 : vector<4x8x1xf32> to vector<4x8x8xf32>
    %63 = arith.subf %59, %62 : vector<4x8x8xf32>
    %64 = math.exp %63 : vector<4x8x8xf32>
    %cst_15 = arith.constant dense<0.000000e+00> : vector<4x8xf32>
    %65 = vector.multi_reduction <add>, %64, %cst_15 [2] : vector<4x8x8xf32> to vector<4x8xf32>
    %66 = vector.shape_cast %65 : vector<4x8xf32> to vector<4x8x1xf32>
    %67 = vector.broadcast %66 : vector<4x8x1xf32> to vector<4x8x8xf32>
    %68 = arith.divf %64, %67 : vector<4x8x8xf32>
    "tpu.trace_start"() <{level = 10 : i32, message = "nqk,nkd->nqd"}> : () -> ()
    %cst_16 = arith.constant dense<0.000000e+00> : vector<4x8x16xf32>
    %69 = tpu.matmul %68, %57, %cst_16 {dimension_numbers = #tpu.dot_dimension_numbers<[2], [1], [1], [2], [0, 0, 0, 1, 1, 2], [0], [0]>} : vector<4x8x8xf32>, vector<4x8x16xf32>, vector<4x8x16xf32> -> vector<4x8x16xf32>
    "tpu.trace_stop"() : () -> ()
    %70 = vector.extract_strided_slice %69 {offsets = [0, 0, 0], sizes = [1, 8, 16], strides = [1, 1, 1]} : vector<4x8x16xf32> to vector<1x8x16xf32>
    %71 = vector.shape_cast %70 : vector<1x8x16xf32> to vector<8x16xf32>
    %72 = vector.extract_strided_slice %69 {offsets = [1, 0, 0], sizes = [1, 8, 16], strides = [1, 1, 1]} : vector<4x8x16xf32> to vector<1x8x16xf32>
    %73 = vector.shape_cast %72 : vector<1x8x16xf32> to vector<8x16xf32>
    %74 = tpu.concatenate %71, %73 in 1 : vector<8x16xf32>, vector<8x16xf32> -> vector<8x32xf32>
    %75 = vector.extract_strided_slice %69 {offsets = [2, 0, 0], sizes = [1, 8, 16], strides = [1, 1, 1]} : vector<4x8x16xf32> to vector<1x8x16xf32>
    %76 = vector.shape_cast %75 : vector<1x8x16xf32> to vector<8x16xf32>
    %77 = vector.extract_strided_slice %69 {offsets = [3, 0, 0], sizes = [1, 8, 16], strides = [1, 1, 1]} : vector<4x8x16xf32> to vector<1x8x16xf32>
    %78 = vector.shape_cast %77 : vector<1x8x16xf32> to vector<8x16xf32>
    %79 = tpu.concatenate %76, %78 in 1 : vector<8x16xf32>, vector<8x16xf32> -> vector<8x32xf32>
    %80 = tpu.concatenate %74, %79 in 0 : vector<8x32xf32>, vector<8x32xf32> -> vector<16x32xf32>
    %c48 = arith.constant 48 : index
    %c0_17 = arith.constant 0 : index
    %81 = vector.load %arg2[%c48, %c0_17] : memref<416x128xf32, #tpu.memory_space<vmem>>, vector<32x32xf32>
    %cst_18 = arith.constant dense<0.000000e+00> : vector<16x32xf32>
    %82 = tpu.matmul %80, %81, %cst_18 {dimension_numbers = #tpu.dot_dimension_numbers<[1], [0], [0], [1], [0, 0, 1, 1], [], []>} : vector<16x32xf32>, vector<32x32xf32>, vector<16x32xf32> -> vector<16x32xf32>
    %83 = vector.extract_strided_slice %25 {offsets = [1, 0], sizes = [1, 32], strides = [1, 1]} : vector<8x128xf32> to vector<1x32xf32>
    %84 = vector.broadcast %83 : vector<1x32xf32> to vector<16x32xf32>
    %85 = arith.addf %82, %84 : vector<16x32xf32>
    %86 = arith.addf %24, %85 : vector<16x32xf32>
    %87 = vector.extract_strided_slice %25 {offsets = [2, 0], sizes = [1, 32], strides = [1, 1]} : vector<8x128xf32> to vector<1x32xf32>
    %88 = vector.extract_strided_slice %25 {offsets = [3, 0], sizes = [1, 32], strides = [1, 1]} : vector<8x128xf32> to vector<1x32xf32>
    %cst_19 = arith.constant dense<0.000000e+00> : vector<16xf32>
    %89 = vector.multi_reduction <add>, %86, %cst_19 [1] : vector<16x32xf32> to vector<16xf32>
    %90 = vector.shape_cast %89 : vector<16xf32> to vector<16x1xf32>
    %cst_20 = arith.constant 3.200000e+01 : f32
    %91 = vector.broadcast %cst_20 : f32 to vector<16x1xf32>
    %92 = arith.divf %90, %91 : vector<16x1xf32>
    %93 = vector.broadcast %92 : vector<16x1xf32> to vector<16x32xf32>
    %94 = arith.subf %86, %93 : vector<16x32xf32>
    %95 = arith.mulf %94, %94 : vector<16x32xf32>
    %cst_21 = arith.constant dense<0.000000e+00> : vector<16xf32>
    %96 = vector.multi_reduction <add>, %95, %cst_21 [1] : vector<16x32xf32> to vector<16xf32>
    %97 = vector.shape_cast %96 : vector<16xf32> to vector<16x1xf32>
    %cst_22 = arith.constant 3.200000e+01 : f32
    %98 = vector.broadcast %cst_22 : f32 to vector<16x1xf32>
    %99 = arith.divf %97, %98 : vector<16x1xf32>
    %cst_23 = arith.constant 9.99999996E-13 : f32
    %100 = vector.broadcast %cst_23 : f32 to vector<16x1xf32>
    %101 = arith.addf %99, %100 : vector<16x1xf32>
    %102 = math.rsqrt %101 : vector<16x1xf32>
    %103 = vector.broadcast %102 : vector<16x1xf32> to vector<16x32xf32>
    %104 = arith.mulf %94, %103 : vector<16x32xf32>
    %105 = vector.broadcast %87 : vector<1x32xf32> to vector<16x32xf32>
    %106 = arith.mulf %104, %105 : vector<16x32xf32>
    %107 = vector.broadcast %88 : vector<1x32xf32> to vector<16x32xf32>
    %108 = arith.addf %106, %107 : vector<16x32xf32>
    %c80 = arith.constant 80 : index
    %c0_24 = arith.constant 0 : index
    %109 = vector.load %arg2[%c80, %c0_24] : memref<416x128xf32, #tpu.memory_space<vmem>>, vector<32x64xf32>
    %c112 = arith.constant 112 : index
    %c0_25 = arith.constant 0 : index
    %110 = vector.load %arg2[%c112, %c0_25] : memref<416x128xf32, #tpu.memory_space<vmem>>, vector<64x32xf32>
    %cst_26 = arith.constant dense<0.000000e+00> : vector<16x64xf32>
    %111 = tpu.matmul %108, %109, %cst_26 {dimension_numbers = #tpu.dot_dimension_numbers<[1], [0], [0], [1], [0, 0, 1, 1], [], []>} : vector<16x32xf32>, vector<32x64xf32>, vector<16x64xf32> -> vector<16x64xf32>
    %112 = vector.extract_strided_slice %25 {offsets = [4, 0], sizes = [1, 64], strides = [1, 1]} : vector<8x128xf32> to vector<1x64xf32>
    %113 = vector.broadcast %112 : vector<1x64xf32> to vector<16x64xf32>
    %114 = arith.addf %111, %113 : vector<16x64xf32>
    %cst_27 = arith.constant 5.000000e-01 : f32
    %115 = vector.broadcast %cst_27 : f32 to vector<16x64xf32>
    %116 = arith.mulf %115, %114 : vector<16x64xf32>
    %cst_28 = arith.constant 4.471500e-02 : f32
    %117 = vector.broadcast %cst_28 : f32 to vector<16x64xf32>
    %118 = arith.mulf %117, %114 : vector<16x64xf32>
    %119 = arith.mulf %118, %114 : vector<16x64xf32>
    %120 = arith.mulf %119, %114 : vector<16x64xf32>
    %121 = arith.addf %114, %120 : vector<16x64xf32>
    %cst_29 = arith.constant 0.797884583 : f32
    %122 = vector.broadcast %cst_29 : f32 to vector<16x64xf32>
    %123 = arith.mulf %122, %121 : vector<16x64xf32>
    %124 = math.tanh %123 : vector<16x64xf32>
    %cst_30 = arith.constant 1.000000e+00 : f32
    %125 = vector.broadcast %cst_30 : f32 to vector<16x64xf32>
    %126 = arith.addf %125, %124 : vector<16x64xf32>
    %127 = arith.mulf %116, %126 : vector<16x64xf32>
    %cst_31 = arith.constant dense<0.000000e+00> : vector<16x32xf32>
    %128 = tpu.matmul %127, %110, %cst_31 {dimension_numbers = #tpu.dot_dimension_numbers<[1], [0], [0], [1], [0, 0, 1, 1], [], []>} : vector<16x64xf32>, vector<64x32xf32>, vector<16x32xf32> -> vector<16x32xf32>
    %129 = vector.extract_strided_slice %25 {offsets = [5, 0], sizes = [1, 32], strides = [1, 1]} : vector<8x128xf32> to vector<1x32xf32>
    %130 = vector.broadcast %129 : vector<1x32xf32> to vector<16x32xf32>
    %131 = arith.addf %128, %130 : vector<16x32xf32>
    %132 = arith.addf %108, %131 : vector<16x32xf32>
    %133 = vector.extract_strided_slice %25 {offsets = [6, 0], sizes = [1, 32], strides = [1, 1]} : vector<8x128xf32> to vector<1x32xf32>
    %134 = vector.extract_strided_slice %25 {offsets = [7, 0], sizes = [1, 32], strides = [1, 1]} : vector<8x128xf32> to vector<1x32xf32>
    %cst_32 = arith.constant dense<0.000000e+00> : vector<16xf32>
    %135 = vector.multi_reduction <add>, %132, %cst_32 [1] : vector<16x32xf32> to vector<16xf32>
    %136 = vector.shape_cast %135 : vector<16xf32> to vector<16x1xf32>
    %cst_33 = arith.constant 3.200000e+01 : f32
    %137 = vector.broadcast %cst_33 : f32 to vector<16x1xf32>
    %138 = arith.divf %136, %137 : vector<16x1xf32>
    %139 = vector.broadcast %138 : vector<16x1xf32> to vector<16x32xf32>
    %140 = arith.subf %132, %139 : vector<16x32xf32>
    %141 = arith.mulf %140, %140 : vector<16x32xf32>
    %cst_34 = arith.constant dense<0.000000e+00> : vector<16xf32>
    %142 = vector.multi_reduction <add>, %141, %cst_34 [1] : vector<16x32xf32> to vector<16xf32>
    %143 = vector.shape_cast %142 : vector<16xf32> to vector<16x1xf32>
    %cst_35 = arith.constant 3.200000e+01 : f32
    %144 = vector.broadcast %cst_35 : f32 to vector<16x1xf32>
    %145 = arith.divf %143, %144 : vector<16x1xf32>
    %cst_36 = arith.constant 9.99999996E-13 : f32
    %146 = vector.broadcast %cst_36 : f32 to vector<16x1xf32>
    %147 = arith.addf %145, %146 : vector<16x1xf32>
    %148 = math.rsqrt %147 : vector<16x1xf32>
    %149 = vector.broadcast %148 : vector<16x1xf32> to vector<16x32xf32>
    %150 = arith.mulf %140, %149 : vector<16x32xf32>
    %151 = vector.broadcast %133 : vector<1x32xf32> to vector<16x32xf32>
    %152 = arith.mulf %150, %151 : vector<16x32xf32>
    %153 = vector.broadcast %134 : vector<1x32xf32> to vector<16x32xf32>
    %154 = arith.addf %152, %153 : vector<16x32xf32>
    %c208 = arith.constant 208 : index
    %c0_37 = arith.constant 0 : index
    %155 = vector.load %arg2[%c208, %c0_37] : memref<416x128xf32, #tpu.memory_space<vmem>>, vector<8x128xf32>
    %c176 = arith.constant 176 : index
    %c0_38 = arith.constant 0 : index
    %156 = vector.load %arg2[%c176, %c0_38] : memref<416x128xf32, #tpu.memory_space<vmem>>, vector<32x96xf32>
    %cst_39 = arith.constant dense<0.000000e+00> : vector<16x96xf32>
    %157 = tpu.matmul %154, %156, %cst_39 {dimension_numbers = #tpu.dot_dimension_numbers<[1], [0], [0], [1], [0, 0, 1, 1], [], []>} : vector<16x32xf32>, vector<32x96xf32>, vector<16x96xf32> -> vector<16x96xf32>
    %158 = vector.extract_strided_slice %155 {offsets = [0, 0], sizes = [1, 96], strides = [1, 1]} : vector<8x128xf32> to vector<1x96xf32>
    %159 = vector.broadcast %158 : vector<1x96xf32> to vector<16x96xf32>
    %160 = arith.addf %157, %159 : vector<16x96xf32>
    %161 = vector.extract_strided_slice %160 {offsets = [0, 0], sizes = [8, 16], strides = [1, 1]} : vector<16x96xf32> to vector<8x16xf32>
    %162 = vector.shape_cast %161 : vector<8x16xf32> to vector<1x8x16xf32>
    %163 = vector.extract_strided_slice %160 {offsets = [0, 16], sizes = [8, 16], strides = [1, 1]} : vector<16x96xf32> to vector<8x16xf32>
    %164 = vector.shape_cast %163 : vector<8x16xf32> to vector<1x8x16xf32>
    %165 = vector.extract_strided_slice %160 {offsets = [8, 0], sizes = [8, 16], strides = [1, 1]} : vector<16x96xf32> to vector<8x16xf32>
    %166 = vector.shape_cast %165 : vector<8x16xf32> to vector<1x8x16xf32>
    %167 = vector.extract_strided_slice %160 {offsets = [8, 16], sizes = [8, 16], strides = [1, 1]} : vector<16x96xf32> to vector<8x16xf32>
    %168 = vector.shape_cast %167 : vector<8x16xf32> to vector<1x8x16xf32>
    %169 = tpu.concatenate %162, %164, %166, %168 in 0 : vector<1x8x16xf32>, vector<1x8x16xf32>, vector<1x8x16xf32>, vector<1x8x16xf32> -> vector<4x8x16xf32>
    %170 = vector.extract_strided_slice %160 {offsets = [0, 32], sizes = [8, 16], strides = [1, 1]} : vector<16x96xf32> to vector<8x16xf32>
    %171 = vector.shape_cast %170 : vector<8x16xf32> to vector<1x8x16xf32>
    %172 = vector.extract_strided_slice %160 {offsets = [0, 48], sizes = [8, 16], strides = [1, 1]} : vector<16x96xf32> to vector<8x16xf32>
    %173 = vector.shape_cast %172 : vector<8x16xf32> to vector<1x8x16xf32>
    %174 = vector.extract_strided_slice %160 {offsets = [8, 32], sizes = [8, 16], strides = [1, 1]} : vector<16x96xf32> to vector<8x16xf32>
    %175 = vector.shape_cast %174 : vector<8x16xf32> to vector<1x8x16xf32>
    %176 = vector.extract_strided_slice %160 {offsets = [8, 48], sizes = [8, 16], strides = [1, 1]} : vector<16x96xf32> to vector<8x16xf32>
    %177 = vector.shape_cast %176 : vector<8x16xf32> to vector<1x8x16xf32>
    %178 = tpu.concatenate %171, %173, %175, %177 in 0 : vector<1x8x16xf32>, vector<1x8x16xf32>, vector<1x8x16xf32>, vector<1x8x16xf32> -> vector<4x8x16xf32>
    %179 = vector.extract_strided_slice %160 {offsets = [0, 64], sizes = [8, 16], strides = [1, 1]} : vector<16x96xf32> to vector<8x16xf32>
    %180 = vector.shape_cast %179 : vector<8x16xf32> to vector<1x8x16xf32>
    %181 = vector.extract_strided_slice %160 {offsets = [0, 80], sizes = [8, 16], strides = [1, 1]} : vector<16x96xf32> to vector<8x16xf32>
    %182 = vector.shape_cast %181 : vector<8x16xf32> to vector<1x8x16xf32>
    %183 = vector.extract_strided_slice %160 {offsets = [8, 64], sizes = [8, 16], strides = [1, 1]} : vector<16x96xf32> to vector<8x16xf32>
    %184 = vector.shape_cast %183 : vector<8x16xf32> to vector<1x8x16xf32>
    %185 = vector.extract_strided_slice %160 {offsets = [8, 80], sizes = [8, 16], strides = [1, 1]} : vector<16x96xf32> to vector<8x16xf32>
    %186 = vector.shape_cast %185 : vector<8x16xf32> to vector<1x8x16xf32>
    %187 = tpu.concatenate %180, %182, %184, %186 in 0 : vector<1x8x16xf32>, vector<1x8x16xf32>, vector<1x8x16xf32>, vector<1x8x16xf32> -> vector<4x8x16xf32>
    "tpu.trace_start"() <{level = 10 : i32, message = "nqd,nkd->nqk"}> : () -> ()
    %cst_40 = arith.constant dense<0.000000e+00> : vector<4x8x8xf32>
    %188 = tpu.matmul %169, %178, %cst_40 {dimension_numbers = #tpu.dot_dimension_numbers<[2], [2], [1], [1], [0, 0, 0, 1, 1, 1], [0], [0]>} : vector<4x8x16xf32>, vector<4x8x16xf32>, vector<4x8x8xf32> -> vector<4x8x8xf32>
    "tpu.trace_stop"() : () -> ()
    %189 = arith.addf %188, %0 : vector<4x8x8xf32>
    %cst_41 = arith.constant dense<0xFF800000> : vector<4x8xf32>
    %190 = vector.multi_reduction <maximumf>, %189, %cst_41 [2] : vector<4x8x8xf32> to vector<4x8xf32>
    %191 = vector.shape_cast %190 : vector<4x8xf32> to vector<4x8x1xf32>
    %192 = vector.broadcast %191 : vector<4x8x1xf32> to vector<4x8x8xf32>
    %193 = arith.subf %189, %192 : vector<4x8x8xf32>
    %194 = math.exp %193 : vector<4x8x8xf32>
    %cst_42 = arith.constant dense<0.000000e+00> : vector<4x8xf32>
    %195 = vector.multi_reduction <add>, %194, %cst_42 [2] : vector<4x8x8xf32> to vector<4x8xf32>
    %196 = vector.shape_cast %195 : vector<4x8xf32> to vector<4x8x1xf32>
    %197 = vector.broadcast %196 : vector<4x8x1xf32> to vector<4x8x8xf32>
    %198 = arith.divf %194, %197 : vector<4x8x8xf32>
    "tpu.trace_start"() <{level = 10 : i32, message = "nqk,nkd->nqd"}> : () -> ()
    %cst_43 = arith.constant dense<0.000000e+00> : vector<4x8x16xf32>
    %199 = tpu.matmul %198, %187, %cst_43 {dimension_numbers = #tpu.dot_dimension_numbers<[2], [1], [1], [2], [0, 0, 0, 1, 1, 2], [0], [0]>} : vector<4x8x8xf32>, vector<4x8x16xf32>, vector<4x8x16xf32> -> vector<4x8x16xf32>
    "tpu.trace_stop"() : () -> ()
    %200 = vector.extract_strided_slice %199 {offsets = [0, 0, 0], sizes = [1, 8, 16], strides = [1, 1, 1]} : vector<4x8x16xf32> to vector<1x8x16xf32>
    %201 = vector.shape_cast %200 : vector<1x8x16xf32> to vector<8x16xf32>
    %202 = vector.extract_strided_slice %199 {offsets = [1, 0, 0], sizes = [1, 8, 16], strides = [1, 1, 1]} : vector<4x8x16xf32> to vector<1x8x16xf32>
    %203 = vector.shape_cast %202 : vector<1x8x16xf32> to vector<8x16xf32>
    %204 = tpu.concatenate %201, %203 in 1 : vector<8x16xf32>, vector<8x16xf32> -> vector<8x32xf32>
    %205 = vector.extract_strided_slice %199 {offsets = [2, 0, 0], sizes = [1, 8, 16], strides = [1, 1, 1]} : vector<4x8x16xf32> to vector<1x8x16xf32>
    %206 = vector.shape_cast %205 : vector<1x8x16xf32> to vector<8x16xf32>
    %207 = vector.extract_strided_slice %199 {offsets = [3, 0, 0], sizes = [1, 8, 16], strides = [1, 1, 1]} : vector<4x8x16xf32> to vector<1x8x16xf32>
    %208 = vector.shape_cast %207 : vector<1x8x16xf32> to vector<8x16xf32>
    %209 = tpu.concatenate %206, %208 in 1 : vector<8x16xf32>, vector<8x16xf32> -> vector<8x32xf32>
    %210 = tpu.concatenate %204, %209 in 0 : vector<8x32xf32>, vector<8x32xf32> -> vector<16x32xf32>
    %c216 = arith.constant 216 : index
    %c0_44 = arith.constant 0 : index
    %211 = vector.load %arg2[%c216, %c0_44] : memref<416x128xf32, #tpu.memory_space<vmem>>, vector<32x32xf32>
    %cst_45 = arith.constant dense<0.000000e+00> : vector<16x32xf32>
    %212 = tpu.matmul %210, %211, %cst_45 {dimension_numbers = #tpu.dot_dimension_numbers<[1], [0], [0], [1], [0, 0, 1, 1], [], []>} : vector<16x32xf32>, vector<32x32xf32>, vector<16x32xf32> -> vector<16x32xf32>
    %213 = vector.extract_strided_slice %155 {offsets = [1, 0], sizes = [1, 32], strides = [1, 1]} : vector<8x128xf32> to vector<1x32xf32>
    %214 = vector.broadcast %213 : vector<1x32xf32> to vector<16x32xf32>
    %215 = arith.addf %212, %214 : vector<16x32xf32>
    %216 = arith.addf %154, %215 : vector<16x32xf32>
    %217 = vector.extract_strided_slice %155 {offsets = [2, 0], sizes = [1, 32], strides = [1, 1]} : vector<8x128xf32> to vector<1x32xf32>
    %218 = vector.extract_strided_slice %155 {offsets = [3, 0], sizes = [1, 32], strides = [1, 1]} : vector<8x128xf32> to vector<1x32xf32>
    %cst_46 = arith.constant dense<0.000000e+00> : vector<16xf32>
    %219 = vector.multi_reduction <add>, %216, %cst_46 [1] : vector<16x32xf32> to vector<16xf32>
    %220 = vector.shape_cast %219 : vector<16xf32> to vector<16x1xf32>
    %cst_47 = arith.constant 3.200000e+01 : f32
    %221 = vector.broadcast %cst_47 : f32 to vector<16x1xf32>
    %222 = arith.divf %220, %221 : vector<16x1xf32>
    %223 = vector.broadcast %222 : vector<16x1xf32> to vector<16x32xf32>
    %224 = arith.subf %216, %223 : vector<16x32xf32>
    %225 = arith.mulf %224, %224 : vector<16x32xf32>
    %cst_48 = arith.constant dense<0.000000e+00> : vector<16xf32>
    %226 = vector.multi_reduction <add>, %225, %cst_48 [1] : vector<16x32xf32> to vector<16xf32>
    %227 = vector.shape_cast %226 : vector<16xf32> to vector<16x1xf32>
    %cst_49 = arith.constant 3.200000e+01 : f32
    %228 = vector.broadcast %cst_49 : f32 to vector<16x1xf32>
    %229 = arith.divf %227, %228 : vector<16x1xf32>
    %cst_50 = arith.constant 9.99999996E-13 : f32
    %230 = vector.broadcast %cst_50 : f32 to vector<16x1xf32>
    %231 = arith.addf %229, %230 : vector<16x1xf32>
    %232 = math.rsqrt %231 : vector<16x1xf32>
    %233 = vector.broadcast %232 : vector<16x1xf32> to vector<16x32xf32>
    %234 = arith.mulf %224, %233 : vector<16x32xf32>
    %235 = vector.broadcast %217 : vector<1x32xf32> to vector<16x32xf32>
    %236 = arith.mulf %234, %235 : vector<16x32xf32>
    %237 = vector.broadcast %218 : vector<1x32xf32> to vector<16x32xf32>
    %238 = arith.addf %236, %237 : vector<16x32xf32>
    %c248 = arith.constant 248 : index
    %c0_51 = arith.constant 0 : index
    %239 = vector.load %arg2[%c248, %c0_51] : memref<416x128xf32, #tpu.memory_space<vmem>>, vector<32x64xf32>
    %c280 = arith.constant 280 : index
    %c0_52 = arith.constant 0 : index
    %240 = vector.load %arg2[%c280, %c0_52] : memref<416x128xf32, #tpu.memory_space<vmem>>, vector<64x32xf32>
    %cst_53 = arith.constant dense<0.000000e+00> : vector<16x64xf32>
    %241 = tpu.matmul %238, %239, %cst_53 {dimension_numbers = #tpu.dot_dimension_numbers<[1], [0], [0], [1], [0, 0, 1, 1], [], []>} : vector<16x32xf32>, vector<32x64xf32>, vector<16x64xf32> -> vector<16x64xf32>
    %242 = vector.extract_strided_slice %155 {offsets = [4, 0], sizes = [1, 64], strides = [1, 1]} : vector<8x128xf32> to vector<1x64xf32>
    %243 = vector.broadcast %242 : vector<1x64xf32> to vector<16x64xf32>
    %244 = arith.addf %241, %243 : vector<16x64xf32>
    %cst_54 = arith.constant 5.000000e-01 : f32
    %245 = vector.broadcast %cst_54 : f32 to vector<16x64xf32>
    %246 = arith.mulf %245, %244 : vector<16x64xf32>
    %cst_55 = arith.constant 4.471500e-02 : f32
    %247 = vector.broadcast %cst_55 : f32 to vector<16x64xf32>
    %248 = arith.mulf %247, %244 : vector<16x64xf32>
    %249 = arith.mulf %248, %244 : vector<16x64xf32>
    %250 = arith.mulf %249, %244 : vector<16x64xf32>
    %251 = arith.addf %244, %250 : vector<16x64xf32>
    %cst_56 = arith.constant 0.797884583 : f32
    %252 = vector.broadcast %cst_56 : f32 to vector<16x64xf32>
    %253 = arith.mulf %252, %251 : vector<16x64xf32>
    %254 = math.tanh %253 : vector<16x64xf32>
    %cst_57 = arith.constant 1.000000e+00 : f32
    %255 = vector.broadcast %cst_57 : f32 to vector<16x64xf32>
    %256 = arith.addf %255, %254 : vector<16x64xf32>
    %257 = arith.mulf %246, %256 : vector<16x64xf32>
    %cst_58 = arith.constant dense<0.000000e+00> : vector<16x32xf32>
    %258 = tpu.matmul %257, %240, %cst_58 {dimension_numbers = #tpu.dot_dimension_numbers<[1], [0], [0], [1], [0, 0, 1, 1], [], []>} : vector<16x64xf32>, vector<64x32xf32>, vector<16x32xf32> -> vector<16x32xf32>
    %259 = vector.extract_strided_slice %155 {offsets = [5, 0], sizes = [1, 32], strides = [1, 1]} : vector<8x128xf32> to vector<1x32xf32>
    %260 = vector.broadcast %259 : vector<1x32xf32> to vector<16x32xf32>
    %261 = arith.addf %258, %260 : vector<16x32xf32>
    %262 = arith.addf %238, %261 : vector<16x32xf32>
    %263 = vector.extract_strided_slice %155 {offsets = [6, 0], sizes = [1, 32], strides = [1, 1]} : vector<8x128xf32> to vector<1x32xf32>
    %264 = vector.extract_strided_slice %155 {offsets = [7, 0], sizes = [1, 32], strides = [1, 1]} : vector<8x128xf32> to vector<1x32xf32>
    %cst_59 = arith.constant dense<0.000000e+00> : vector<16xf32>
    %265 = vector.multi_reduction <add>, %262, %cst_59 [1] : vector<16x32xf32> to vector<16xf32>
    %266 = vector.shape_cast %265 : vector<16xf32> to vector<16x1xf32>
    %cst_60 = arith.constant 3.200000e+01 : f32
    %267 = vector.broadcast %cst_60 : f32 to vector<16x1xf32>
    %268 = arith.divf %266, %267 : vector<16x1xf32>
    %269 = vector.broadcast %268 : vector<16x1xf32> to vector<16x32xf32>
    %270 = arith.subf %262, %269 : vector<16x32xf32>
    %271 = arith.mulf %270, %270 : vector<16x32xf32>
    %cst_61 = arith.constant dense<0.000000e+00> : vector<16xf32>
    %272 = vector.multi_reduction <add>, %271, %cst_61 [1] : vector<16x32xf32> to vector<16xf32>
    %273 = vector.shape_cast %272 : vector<16xf32> to vector<16x1xf32>
    %cst_62 = arith.constant 3.200000e+01 : f32
    %274 = vector.broadcast %cst_62 : f32 to vector<16x1xf32>
    %275 = arith.divf %273, %274 : vector<16x1xf32>
    %cst_63 = arith.constant 9.99999996E-13 : f32
    %276 = vector.broadcast %cst_63 : f32 to vector<16x1xf32>
    %277 = arith.addf %275, %276 : vector<16x1xf32>
    %278 = math.rsqrt %277 : vector<16x1xf32>
    %279 = vector.broadcast %278 : vector<16x1xf32> to vector<16x32xf32>
    %280 = arith.mulf %270, %279 : vector<16x32xf32>
    %281 = vector.broadcast %263 : vector<1x32xf32> to vector<16x32xf32>
    %282 = arith.mulf %280, %281 : vector<16x32xf32>
    %283 = vector.broadcast %264 : vector<1x32xf32> to vector<16x32xf32>
    %284 = arith.addf %282, %283 : vector<16x32xf32>
    %285 = vector.extract_strided_slice %284 {offsets = [0, 0], sizes = [1, 32], strides = [1, 1]} : vector<16x32xf32> to vector<1x32xf32>
    %286 = vector.extract_strided_slice %284 {offsets = [8, 0], sizes = [1, 32], strides = [1, 1]} : vector<16x32xf32> to vector<1x32xf32>
    %287 = tpu.concatenate %285, %286 in 0 : vector<1x32xf32>, vector<1x32xf32> -> vector<2x32xf32>
    %c408 = arith.constant 408 : index
    %c0_64 = arith.constant 0 : index
    %288 = vector.load %arg2[%c408, %c0_64] : memref<416x128xf32, #tpu.memory_space<vmem>>, vector<8x128xf32>
    %c344 = arith.constant 344 : index
    %c0_65 = arith.constant 0 : index
    %289 = vector.load %arg2[%c344, %c0_65] : memref<416x128xf32, #tpu.memory_space<vmem>>, vector<32x32xf32>
    %cst_66 = arith.constant dense<0.000000e+00> : vector<2x32xf32>
    %290 = tpu.matmul %287, %289, %cst_66 {dimension_numbers = #tpu.dot_dimension_numbers<[1], [0], [0], [1], [0, 0, 1, 1], [], []>} : vector<2x32xf32>, vector<32x32xf32>, vector<2x32xf32> -> vector<2x32xf32>
    %291 = vector.extract_strided_slice %288 {offsets = [0, 0], sizes = [1, 32], strides = [1, 1]} : vector<8x128xf32> to vector<1x32xf32>
    %292 = vector.broadcast %291 : vector<1x32xf32> to vector<2x32xf32>
    %293 = arith.addf %290, %292 : vector<2x32xf32>
    %294 = math.tanh %293 : vector<2x32xf32>
    %c376 = arith.constant 376 : index
    %c0_67 = arith.constant 0 : index
    %295 = vector.load %arg2[%c376, %c0_67] : memref<416x128xf32, #tpu.memory_space<vmem>>, vector<32x2xf32>
    %cst_68 = arith.constant dense<0.000000e+00> : vector<2x2xf32>
    %296 = tpu.matmul %294, %295, %cst_68 {dimension_numbers = #tpu.dot_dimension_numbers<[1], [0], [0], [1], [0, 0, 1, 1], [], []>} : vector<2x32xf32>, vector<32x2xf32>, vector<2x2xf32> -> vector<2x2xf32>
    %297 = vector.extract_strided_slice %288 {offsets = [1, 0], sizes = [1, 2], strides = [1, 1]} : vector<8x128xf32> to vector<1x2xf32>
    %298 = vector.broadcast %297 : vector<1x2xf32> to vector<2x2xf32>
    %299 = arith.addf %296, %298 : vector<2x2xf32>
    %c0_69 = arith.constant 0 : index
    %c0_70 = arith.constant 0 : index
    %300 = vector.load %arg3[%c0_69, %c0_70] : memref<2x2xf32, #tpu.memory_space<vmem>>, vector<2x2xf32>
    tpu.vector_store %arg3[%c0_69, %c0_70], %299 {strides = array<i32>} : memref<2x2xf32, #tpu.memory_space<vmem>>, vector<2x2xf32>,
    return
  }
}

</mosaic_0001>

<bundles_post_ra>
// kernel: sentiment_classifier_forward.1
= control target key start
LH: loop header
LB: loop body
LE: loop exit
PB: predicated region body
PF: predicated region fallthrough
CT: control target
= control target key end

     0   :  { %8 = vsyncpa [#allocation3], 0  ;;  %s1831_s0 = inlined_call_operand.vmem [shape: f32[16,32], index: 0, kind: input, shape index: {}]   ;;  %s1832_s1 = inlined_call_operand.vmem [shape: f32[4,8,8], index: 1, kind: input, shape index: {}]   ;;  %s1833_s2 = inlined_call_operand.hbm [shape: f32[416,128], index: 2, kind: input, shape index: {}]   ;;  %s1834_s3 = inlined_call_operand.hbm [shape: f32[2,2], index: 3, kind: output, shape index: {}]  }
   0x1   :  { %9 = vsyncpa [#allocation4], 0  ;;  %s18_s14 = sshll.u32 %s1833_s2, 4  ;;  %s1529_s15 = smov [#allocation2]   ;;  %s19_s14 = int_to_ptr.hbm [resolvable:$true] %s18_s14 }
   0x2   :  { %s20_s16 = sshll.u32 %s1529_s15, 4  ;;  %s1530_s17 = smov 128   ;;  %s21_s16 = int_to_ptr.vmem [resolvable:$true] %s20_s16 }
   0x3   :  { %s1531_s18 = smov 8  }
   0x4   :  { %26 = dma.hbm_to_vmem [thread:$0]  %s19_s14, 6656, %s21_s16, [#allocation3], %s1530_s17, %s1530_s17, %s1531_s18  }
   0x5   :  { %1525 = dma.done.wait [#allocation3], 6656  }
   0x6   :  { %1526 = vsyncadd [#allocation3], 4294960640  ;;  %vm38_vm0 = vcmask 261120   ;;  %v36_v0 = vld [vmem:[%s1831_s0] sm:$0xff]  ;;  %v37_v2 = vld [vmem:[%s1831_s0 + $0x8] sm:$0xff]  ;;  %v1532_v4 = vmov 32.0  }
   0x7   :  { %v39_v1 = vsel %vm38_vm0, %v36_v0, 0.0  ;;  %v42_v3 = vsel %vm38_vm0, %v37_v2, 0.0  ;;  %1413 = vrcp.f32 %v1532_v4  ;;  %v100_v21 = vld [vmem:[#allocation2 + $0x20] sm:$0xff]  ;;  %v99_v22 = vld [vmem:[#allocation2 + $0x18] sm:$0xff]  ;;  %v98_v23 = vld [vmem:[#allocation2 + $0x10] sm:$0xff]  ;;  %s1533_s0 = smov 96  }
   0x8   :  { %40 = vadd.xlane.f32.xlu0 %v39_v1  ;;  %120 = vmatpush.msra.mxu0 %v100_v21  ;;  %v97_v24 = vld [vmem:[#allocation2 + $0x8] sm:$0xff]  ;;  %v35_v36 = vld [vmem:[#allocation2] sm:$0xff]  ;;  %s1534_s2 = smov 112   ;;  %vm139_vm8 = vcmask 130048   ;;  %vm242_vm9 = vcmask 64512   ;;  %s1536_s4 = smov 16  }
   0x9   :  { %v90_v40 = vperm.slane %v35_v36, 0  ;;  %v93_v44 = vperm.slane %v35_v36, 1  ;;  %v1585_v54 = vld [vmem:[#allocation2 + $0x28] sm:$0xff]  ;;  %s1537_s5 = smov [#allocation5]   ;;  %s1337_s9 = sshll.u32 %s1834_s3, 4  ;;  %s1338_s9 = int_to_ptr.hbm [resolvable:$true] %s1337_s9 }
   0xa   :  { %121 = vmatpush.msra.mxu0 %v99_v22  ;;  %v101_v55 = vperm.slane %v1585_v54, 0  ;;  %s1335_s6 = sshll.u32 %s1537_s5, 4  ;;  %s1336_s6 = int_to_ptr.vmem [resolvable:$true] %s1335_s6 }
   0xc   :  { %122 = vmatpush.msra.mxu0 %v98_v23 }
   0xd   :  { %v1414_v5 = vpop.eup %1413 }
   0xe   :  { %v46_v6 = vmul.f32 32.0, %v1414_v5  ;;  %vm50_vm1 = vweird.f32 %v1414_v5  ;;  %123 = vmatpush.msra.mxu0 %v97_v24 }
  0x10   :  { %43 = vadd.xlane.f32.xlu0 %v42_v3  ;;  %v47_v7 = vsub.f32 1.0, %v46_v6  ;;  %v1626_v6 = vld [vmem:[%s1832_s1 + $0x18] sm:$0xff] }
  0x12   :  { %v48_v8 = vmul.f32 %v1414_v5, %v47_v7 }
  0x14   :  { %v49_v9 = vadd.f32 %v1414_v5, %v48_v8 }
  0x16   :  { %v1569_v10 = vsel %vm50_vm1, %v1414_v5, %v49_v9 }
  0x7b   :  { %v41_v11 = vpop.xlane.xlu0 %40 }
  0x7c   :  { %v52_v12 = vmul.f32 %v1569_v10, %v41_v11  ;;  %v1633_v11 = vld [vmem:[%s1832_s1 + $0x10] sm:$0xff] }
  0x7e   :  { %v54_v13 = vsub.f32 %v36_v0, %v52_v12 }
  0x80   :  { %v56_v14 = vmul.f32 %v54_v13, %v54_v13 }
  0x82   :  { %v58_v15 = vsel %vm38_vm0, %v56_v14, 0.0 }
  0x83   :  { %59 = vadd.xlane.f32.xlu1 %v58_v15  ;;  %v44_v16 = vpop.xlane.xlu0 %43 }
  0x84   :  { %v53_v17 = vmul.f32 %v1569_v10, %v44_v16 }
  0x86   :  { %v55_v18 = vsub.f32 %v37_v2, %v53_v17  ;;  %v1619_v2 = vld [vmem:[%s1832_s1] sm:$0xff] }
  0x88   :  { %v57_v19 = vmul.f32 %v55_v18, %v55_v18 }
  0x8a   :  { %v61_v20 = vsel %vm38_vm0, %v57_v19, 0.0 }
  0x8b   :  { %62 = vadd.xlane.f32.xlu1 %v61_v20 }
  0xf6   :  { %v60_v25 = vpop.xlane.xlu1 %59 }
  0xf7   :  { %v64_v26 = vmul.f32 %v60_v25, %v1569_v10 }
  0xf9   :  { %v66_v27 = vadd.f32 1e-12, %v64_v26 }
  0xfb   :  { %1415 = vrsqrt.f32 %v66_v27  ;;  %vm74_vm3 = vweird.f32 %v66_v27 }
  0xfe   :  { %v63_v28 = vpop.xlane.xlu1 %62 }
  0xff   :  { %v65_v29 = vmul.f32 %v63_v28, %v1569_v10 }
 0x101   :  { %v1416_v30 = vpop.eup %1415  ;;  %v67_v31 = vadd.f32 1e-12, %v65_v29 }
 0x102   :  { %v69_v32 = vmul.f32 %v1416_v30, %v66_v27  ;;  %vm75_vm2 = vweird.f32 %v1416_v30 }
 0x103   :  { %1417 = vrsqrt.f32 %v67_v31  ;;  %vm76_vm4 = vmor %vm74_vm3, %vm75_vm2  ;;  %vm84_vm5 = vweird.f32 %v67_v31 }
 0x104   :  { %v70_v33 = vmul.f32 %v1416_v30, %v69_v32 }
 0x106   :  { %v71_v34 = vmul.f32 0.5, %v70_v33 }
 0x108   :  { %v72_v35 = vsub.f32 1.5, %v71_v34 }
 0x109   :  { %v1418_v37 = vpop.eup %1417 }
 0x10a   :  { %v73_v38 = vmul.f32 %v1416_v30, %v72_v35  ;;  %v79_v39 = vmul.f32 %v1418_v37, %v67_v31  ;;  %vm85_vm6 = vweird.f32 %v1418_v37 }
 0x10b   :  { %vm86_vm7 = vmor %vm84_vm5, %vm85_vm6 }
 0x10c   :  { %v77_v41 = vsel %vm76_vm4, %v1416_v30, %v73_v38  ;;  %v80_v42 = vmul.f32 %v1418_v37, %v79_v39 }
 0x10d   :  { %v88_v43 = vmul.f32 %v77_v41, %v54_v13  ;;  %v1638_v13 = vld [vmem:[%s1832_s1 + $0x8] sm:$0xff]  ;;  %s1535_s1 = smov 64  }
 0x10e   :  { %v81_v45 = vmul.f32 0.5, %v80_v42 }
 0x10f   :  { %v91_v46 = vmul.f32 %v90_v40, %v88_v43 }
 0x110   :  { %v82_v47 = vsub.f32 1.5, %v81_v45 }
 0x111   :  { %v1577_v48 = vadd.f32 %v93_v44, %v91_v46 }
 0x112   :  { %v83_v49 = vmul.f32 %v1418_v37, %v82_v47 }
 0x113   :  { %1347 = vmatmul.msk.f32.vlgmr.msra.gmra.mxu0 %vm38_vm0, %v1577_v48 }
 0x114   :  { %v87_v50 = vsel %vm86_vm7, %v1418_v37, %v83_v49 }
 0x115   :  { %v89_v51 = vmul.f32 %v87_v50, %v55_v18 }
 0x117   :  { %v92_v52 = vmul.f32 %v90_v40, %v89_v51 }
 0x119   :  { %v1581_v53 = vadd.f32 %v93_v44, %v92_v52 }
 0x11b   :  { %1348 = vmatmul.msk.f32.gmra.mxu0 %vm38_vm0, %v1581_v53 }
 0x190   :  { %v125_v56 = vpop.f32.mrf.mxu0 }
 0x191   :  { %v1588_v57 = vadd.f32 %v125_v56, %v101_v55 }
 0x193   :  { %137 = vrot.lane.b32.xlu0 %v1588_v57, %s1533_s0  ;;  %132 = vrot.lane.b32.xlu2 %v1588_v57, %s1534_s2 }
 0x198   :  { %v128_v58 = vpop.f32.mrf.mxu0 }
 0x199   :  { %v1594_v59 = vadd.f32 %v128_v58, %v101_v55 }
 0x19b   :  { %135 = vrot.lane.b32.xlu2 %v1594_v59, %s1534_s2 }
 0x1ed   :  { %v1598_v60 = vpop.permute.xlu2 %132 }
 0x1ee   :  { %164 = vrot.lane.b32.xlu1 %v1598_v60, %s1533_s0  ;;  %v1398_v39 = vpack.i.bf16 %v1598_v60, %v1588_v57 }
 0x1f5   :  { %v136_v61 = vpop.permute.xlu2 %135 }
 0x1f6   :  { %216 = vrot.lane.b32.xlu2 %v136_v61, %s1533_s0 }
 0x1fe   :  { %190 = vrot.lane.b32.xlu2 %v1594_v59, %s1533_s0 }
 0x205   :  { %v138_v62 = vpop.permute.xlu0 %137 }
 0x206   :  { %1349 = vmatpush.xpose.msk.msra.mxu1 %vm139_vm8, %v138_v62 }
 0x209   :  { %1350 = vmatmul.msk.f32.vlgmr.msra.gmra.mxu1 %vm139_vm8, %v1588_v57 }
 0x250   :  { %v217_v63 = vpop.permute.xlu2 %216 }
 0x251   :  { %1355 = vmatpush.xpose.msk.msrb.mxu1 %vm139_vm8, %v217_v63 }
 0x254   :  { %1356 = vmatmul.msk.f32.vlgmr.msrb.gmra.mxu1 %vm139_vm8, %v136_v61 }
 0x258   :  { %v191_v0 = vpop.permute.xlu2 %190 }
 0x259   :  { %1353 = vmatpush.xpose.msk.msra.mxu3 %vm139_vm8, %v191_v0 }
 0x25c   :  { %1354 = vmatmul.msk.f32.vlgmr.msra.gmra.mxu3 %vm139_vm8, %v1594_v59 }
 0x260   :  { %v165_v1 = vpop.permute.xlu1 %164 }
 0x261   :  { %1351 = vmatpush.xpose.msk.msrb.mxu0 %vm139_vm8, %v165_v1 }
 0x264   :  { %1352 = vmatmul.msk.f32.vlgmr.msrb.gmra.mxu0 %vm139_vm8, %v1598_v60 }
 0x286   :  { %v161_v3 = vpop.f32.mrf.mxu1 }
 0x287   :  { %v162_v4 = vadd.f32 %v161_v3, %v1619_v2 }
 0x289   :  { %v243_v5 = vsel %vm242_vm9, %v162_v4, -inf }
 0x28a   :  { %244 = vmax.xlane.f32.xlu2 %v243_v5 }
 0x2d1   :  { %v239_v7 = vpop.f32.mrf.mxu1 }
 0x2d2   :  { %v240_v8 = vadd.f32 %v239_v7, %v1626_v6 }
 0x2d4   :  { %v252_v9 = vsel %vm242_vm9, %v240_v8, -inf }
 0x2d5   :  { %253 = vmax.xlane.f32.xlu1 %v252_v9 }
 0x2df   :  { %v213_v12 = vpop.f32.mrf.mxu3 }
 0x2e0   :  { %v214_v14 = vadd.f32 %v213_v12, %v1633_v11 }
 0x2e1   :  { %v187_v15 = vpop.f32.mrf.mxu0 }
 0x2e2   :  { %v188_v16 = vadd.f32 %v187_v15, %v1638_v13  ;;  %v249_v17 = vsel %vm242_vm9, %v214_v14, -inf }
 0x2e3   :  { %250 = vmax.xlane.f32.xlu2 %v249_v17 }
 0x2e4   :  { %v246_v18 = vsel %vm242_vm9, %v188_v16, -inf }
 0x2e5   :  { %247 = vmax.xlane.f32.xlu0 %v246_v18 }
 0x2fd   :  { %v245_v19 = vpop.xlane.xlu2 %244 }
 0x2fe   :  { %v255_v20 = vsub.f32 %v162_v4, %v245_v19 }
 0x300   :  { %v259_v21 = vmul.f32 1.442695, %v255_v20 }
 0x302   :  { %1419 = vpow2.f32 %v259_v21 }
 0x308   :  { %v1644_v22 = vpop.eup %1419 }
 0x309   :  { %v267_v23 = vsel %vm242_vm9, %v1644_v22, 0.0 }
 0x30a   :  { %268 = vadd.xlane.f32.xlu2 %v267_v23 }
 0x322   :  { %417 = vrot.lane.b32.xlu2 %v136_v61, %s1535_s1 }
 0x348   :  { %v254_v24 = vpop.xlane.xlu1 %253 }
 0x349   :  { %v258_v25 = vsub.f32 %v240_v8, %v254_v24 }
 0x34b   :  { %v265_v26 = vmul.f32 1.442695, %v258_v25 }
 0x34d   :  { %1421 = vpow2.f32 %v265_v26 }
 0x353   :  { %v1649_v27 = vpop.eup %1421 }
 0x354   :  { %v276_v28 = vsel %vm242_vm9, %v1649_v27, 0.0 }
 0x355   :  { %277 = vadd.xlane.f32.xlu1 %v276_v28 }
 0x356   :  { %v251_v29 = vpop.xlane.xlu2 %250 }
 0x357   :  { %v257_v30 = vsub.f32 %v214_v14, %v251_v29 }
 0x358   :  { %v248_v31 = vpop.xlane.xlu0 %247 }
 0x359   :  { %v263_v32 = vmul.f32 1.442695, %v257_v30  ;;  %v256_v33 = vsub.f32 %v188_v16, %v248_v31 }
 0x35b   :  { %1423 = vpow2.f32 %v263_v32  ;;  %v261_v34 = vmul.f32 1.442695, %v256_v33 }
 0x35d   :  { %1425 = vpow2.f32 %v261_v34 }
 0x361   :  { %v1653_v35 = vpop.eup %1423 }
 0x362   :  { %v273_v36 = vsel %vm242_vm9, %v1653_v35, 0.0 }
 0x363   :  { %v1657_v37 = vpop.eup %1425  ;;  %274 = vadd.xlane.f32.xlu1 %v273_v36 }
 0x364   :  { %v270_v38 = vsel %vm242_vm9, %v1657_v37, 0.0 }
 0x365   :  { %271 = vadd.xlane.f32.xlu0 %v270_v38 }
 0x379   :  { %1399 = vrot.lane.b32.xlu0 %v1398_v39, %s1535_s1 }
 0x37c   :  { %391 = vrot.lane.b32.xlu1 %v1594_v59, %s1535_s1 }
 0x37d   :  { %v269_v40 = vpop.xlane.xlu2 %268 }
 0x37e   :  { %1427 = vrcp.f32 %v269_v40  ;;  %vm284_vm10 = vweird.f32 %v269_v40  ;;  %v290_v62 = vand.u32 2147483648, %v269_v40  ;;  %v288_v4 = vand.u32 2147483647, %v269_v40 }
 0x380   :  { %v291_v14 = vor.u32 1.1754944e-38, %v290_v62  ;;  %vm289_vm5 = vcmp.eq.f32.partialorder %v288_v4, 8.507059e+37 }
 0x384   :  { %v1428_v42 = vpop.eup %1427 }
 0x385   :  { %v280_v44 = vmul.f32 %v1428_v42, %v269_v40  ;;  %vm285_vm11 = vweird.f32 %v1428_v42  ;;  %v418_v33 = vpop.permute.xlu2 %417 }
 0x386   :  { %vm286_vm15 = vmor %vm284_vm10, %vm285_vm11 }
 0x387   :  { %v281_v46 = vsub.f32 1.0, %v280_v44  ;;  %v453_v44 = vld [vmem:[#allocation2 + $0x30] sm:$0xff] }
 0x389   :  { %v282_v52 = vmul.f32 %v1428_v42, %v281_v46 }
 0x38b   :  { %v283_v61 = vadd.f32 %v1428_v42, %v282_v52 }
 0x38d   :  { %v287_v12 = vsel %vm286_vm15, %v1428_v42, %v283_v61  ;;  %v455_v42 = vld [vmem:[#allocation2 + $0x40] sm:$0xff] }
 0x38e   :  { %v292_v19 = vsel %vm289_vm5, %v291_v14, %v287_v12  ;;  %v539_v12 = vld [vmem:[#allocation2 + $0x50] sm:$0xff] }
 0x38f   :  { %v293_v30 = vmul.f32 %v1644_v22, %v292_v19 }
 0x3c8   :  { %v1666_v41 = vpop.xlane.xlu1 %277 }
 0x3c9   :  { %1429 = vrcp.f32 %v1666_v41  ;;  %v335_v24 = vand.u32 2147483648, %v1666_v41  ;;  %vm329_vm10 = vweird.f32 %v1666_v41  ;;  %v333_v29 = vand.u32 2147483647, %v1666_v41 }
 0x3cb   :  { %v336_v38 = vor.u32 1.1754944e-38, %v335_v24 }
 0x3cf   :  { %v1669_v47 = vpop.eup %1429 }
 0x3d0   :  { %v325_v55 = vmul.f32 %v1669_v47, %v1666_v41  ;;  %vm330_vm6 = vweird.f32 %v1669_v47 }
 0x3d1   :  { %vm331_vm11 = vmor %vm329_vm10, %vm330_vm6 }
 0x3d2   :  { %v326_v60 = vsub.f32 1.0, %v325_v55 }
 0x3d4   :  { %v327_v8 = vmul.f32 %v1669_v47, %v326_v60 }
 0x3d6   :  { %v275_v43 = vpop.xlane.xlu1 %274  ;;  %v328_v21 = vadd.f32 %v1669_v47, %v327_v8  ;;  %v541_v8 = vld [vmem:[#allocation2 + $0x60] sm:$0xff] }
 0x3d7   :  { %1431 = vrcp.f32 %v275_v43  ;;  %v320_v5 = vand.u32 2147483648, %v275_v43  ;;  %vm314_vm1 = vweird.f32 %v275_v43  ;;  %v318_v9 = vand.u32 2147483647, %v275_v43 }
 0x3d8   :  { %v272_v45 = vpop.xlane.xlu0 %271  ;;  %v332_v36 = vsel %vm331_vm11, %v1669_v47, %v328_v21 }
 0x3d9   :  { %1433 = vrcp.f32 %v272_v45  ;;  %v305_v0 = vand.u32 2147483648, %v272_v45  ;;  %v303_v3 = vand.u32 2147483647, %v272_v45  ;;  %vm299_vm14 = vweird.f32 %v272_v45 }
 0x3da   :  { %v321_v18 = vor.u32 1.1754944e-38, %v320_v5  ;;  %vm319_vm7 = vcmp.eq.f32.partialorder %v318_v9, 8.507059e+37  ;;  %v540_v9 = vld [vmem:[#allocation2 + $0x58] sm:$0xff] }
 0x3db   :  { %v306_v15 = vor.u32 1.1754944e-38, %v305_v0  ;;  %vm304_vm4 = vcmp.eq.f32.partialorder %v303_v3, 8.507059e+37 }
 0x3dd   :  { %v1432_v49 = vpop.eup %1431 }
 0x3de   :  { %v310_v50 = vmul.f32 %v1432_v49, %v275_v43  ;;  %vm315_vm13 = vweird.f32 %v1432_v49  ;;  %v454_v43 = vld [vmem:[#allocation2 + $0x38] sm:$0xff] }
 0x3df   :  { %v1434_v51 = vpop.eup %1433  ;;  %vm316_vm3 = vmor %vm314_vm1, %vm315_vm13 }
 0x3e0   :  { %v311_v56 = vsub.f32 1.0, %v310_v50  ;;  %v295_v57 = vmul.f32 %v1434_v51, %v272_v45  ;;  %vm300_vm12 = vweird.f32 %v1434_v51  ;;  %v457_v50 = vperm.slane %v1585_v54, 1 }
 0x3e1   :  { %vm301_vm2 = vmor %vm299_vm14, %vm300_vm12  ;;  %vm334_vm12 = vcmp.eq.f32.partialorder %v333_v29, 8.507059e+37 }
 0x3e2   :  { %v312_v58 = vmul.f32 %v1432_v49, %v311_v56  ;;  %v296_v59 = vsub.f32 1.0, %v295_v57  ;;  %v337_v22 = vsel %vm334_vm12, %v336_v38, %v332_v36 }
 0x3e4   :  { %v297_v63 = vmul.f32 %v1434_v51, %v296_v59  ;;  %v313_v1 = vadd.f32 %v1432_v49, %v312_v58 }
 0x3e6   :  { %v298_v7 = vadd.f32 %v1434_v51, %v297_v63  ;;  %v317_v17 = vsel %vm316_vm3, %v1432_v49, %v313_v1 }
 0x3e7   :  { %v322_v25 = vsel %vm319_vm7, %v321_v18, %v317_v17 }
 0x3e8   :  { %v302_v16 = vsel %vm301_vm2, %v1434_v51, %v298_v7  ;;  %v323_v34 = vmul.f32 %v1653_v35, %v322_v25  ;;  %v456_v35 = vld [vmem:[#allocation2 + $0x48] sm:$0xff] }
 0x3e9   :  { %v307_v20 = vsel %vm304_vm4, %v306_v15, %v302_v16  ;;  %vm600_vm4 = vcmask 523264  }
 0x3ea   :  { %v308_v31 = vmul.f32 %v1657_v37, %v307_v20  ;;  %v338_v37 = vmul.f32 %v1649_v27, %v337_v22 }
 0x3eb   :  { %v1400_v23 = vpop.permute.xlu0 %1399 }
 0x3ec   :  { %v1401_v26 = vunpack.i.l.bf16 %v1400_v23  ;;  %v1402_v28 = vunpack.i.h.bf16 %v1400_v23 }
 0x3ee   :  { %360 = vmatpush.msra.mxu2 %v1401_v26  ;;  %386 = vmatpush.msrb.mxu3 %v1402_v28  ;;  %v392_v32 = vpop.permute.xlu1 %391 }
 0x3ef   :  { %1357 = vmatmul.msk.f32.vlgmr.msra.gmra.mxu2 %vm242_vm9, %v293_v30  ;;  %1358 = vmatmul.msk.f32.vlgmr.msrb.gmra.mxu3 %vm242_vm9, %v308_v31  ;;  %v533_v30 = vperm.slane %v1585_v54, 2 }
 0x3f0   :  { %412 = vmatpush.msra.mxu1 %v392_v32  ;;  %438 = vmatpush.msrb.mxu2 %v418_v33 }
 0x3f1   :  { %1359 = vmatmul.msk.f32.vlgmr.msra.gmra.mxu1 %vm242_vm9, %v323_v34  ;;  %476 = vmatpush.msra.mxu3 %v456_v35  ;;  %v536_v34 = vperm.slane %v1585_v54, 3 }
 0x3f3   :  { %477 = vmatpush.msra.mxu3 %v455_v42 }
 0x3f5   :  { %478 = vmatpush.msra.mxu3 %v454_v43  ;;  %v550_v43 = vld [vmem:[#allocation2 + $0xa8] sm:$0xff] }
 0x3f6   :  { %615 = vmatpush.msrb.mxu1 %v550_v43 }
 0x3f7   :  { %1360 = vmatmul.msk.f32.vlgmr.msrb.gmra.mxu2 %vm242_vm9, %v338_v37  ;;  %479 = vmatpush.msra.mxu3 %v453_v44  ;;  %v549_v44 = vld [vmem:[#allocation2 + $0xa0] sm:$0xff] }
 0x3f8   :  { %616 = vmatpush.msrb.mxu1 %v549_v44 }
 0x46e   :  { %v414_v47 = vpop.f32.mrf.mxu1 }
 0x472   :  { %v362_v39 = vpop.f32.mrf.mxu2  ;;  %v388_v40 = vpop.f32.mrf.mxu3 }
 0x473   :  { %444 = vrot.lane.b32.xlu0 %v388_v40, %s1536_s4 }
 0x47a   :  { %v440_v41 = vpop.f32.mrf.mxu2 }
 0x47b   :  { %449 = vrot.lane.b32.xlu2 %v440_v41, %s1536_s4 }
 0x4d5   :  { %v450_v46 = vpop.permute.xlu2 %449 }
 0x4d6   :  { %v452_v49 = vsel %vm139_vm8, %v414_v47, %v450_v46  ;;  %v546_v46 = vld [vmem:[#allocation2 + $0x88] sm:$0xff]  ;;  %v545_v47 = vld [vmem:[#allocation2 + $0x80] sm:$0xff] }
 0x4e5   :  { %v445_v45 = vpop.permute.xlu0 %444 }
 0x4e6   :  { %v447_v27 = vsel %vm139_vm8, %v362_v39, %v445_v45  ;;  %v548_v45 = vld [vmem:[#allocation2 + $0x98] sm:$0xff] }
 0x4e7   :  { %1361 = vmatmul.msk.f32.vlgmr.msra.gmra.mxu3 %vm38_vm0, %v447_v27  ;;  %v547_v27 = vld [vmem:[#allocation2 + $0x90] sm:$0xff]  ;;  %617 = vmatpush.msrb.mxu1 %v548_v45 }
 0x4e9   :  { %618 = vmatpush.msrb.mxu1 %v547_v27 }
 0x4eb   :  { %619 = vmatpush.msrb.mxu1 %v546_v46 }
 0x4ed   :  { %620 = vmatpush.msrb.mxu1 %v545_v47 }
 0x4ef   :  { %1362 = vmatmul.msk.f32.gmra.mxu3 %vm38_vm0, %v452_v49  ;;  %v544_v49 = vld [vmem:[#allocation2 + $0x78] sm:$0xff] }
 0x4f0   :  { %621 = vmatpush.msrb.mxu1 %v544_v49 }
 0x56a   :  { %v481_v51 = vpop.f32.mrf.mxu3 }
 0x56b   :  { %v482_v52 = vadd.f32 %v481_v51, %v457_v50  ;;  %v551_v51 = vperm.slane %v1585_v54, 4 }
 0x56d   :  { %v487_v55 = vadd.f32 %v482_v52, %v1577_v48 }
 0x56f   :  { %v489_v56 = vsel %vm38_vm0, %v487_v55, 0.0 }
 0x570   :  { %490 = vadd.xlane.f32.xlu0 %v489_v56 }
 0x572   :  { %v484_v57 = vpop.f32.mrf.mxu3 }
 0x573   :  { %v485_v58 = vadd.f32 %v484_v57, %v457_v50  ;;  %v543_v50 = vld [vmem:[#allocation2 + $0x70] sm:$0xff] }
 0x574   :  { %622 = vmatpush.msrb.mxu1 %v543_v50 }
 0x575   :  { %v488_v59 = vadd.f32 %v485_v58, %v1581_v53  ;;  %v542_v53 = vld [vmem:[#allocation2 + $0x68] sm:$0xff] }
 0x576   :  { %570 = vmatpush.msra.mxu0 %v542_v53 }
 0x577   :  { %v492_v60 = vsel %vm38_vm0, %v488_v59, 0.0 }
 0x578   :  { %493 = vadd.xlane.f32.xlu2 %v492_v60  ;;  %571 = vmatpush.msra.mxu0 %v541_v8 }
 0x57a   :  { %572 = vmatpush.msra.mxu0 %v540_v9 }
 0x57c   :  { %573 = vmatpush.msra.mxu0 %v539_v12 }
 0x5e3   :  { %v491_v61 = vpop.xlane.xlu0 %490 }
 0x5e4   :  { %v495_v62 = vmul.f32 %v491_v61, %v1569_v10 }
 0x5e6   :  { %v497_v63 = vsub.f32 %v487_v55, %v495_v62 }
 0x5e8   :  { %v499_v0 = vmul.f32 %v497_v63, %v497_v63 }
 0x5ea   :  { %v501_v1 = vsel %vm38_vm0, %v499_v0, 0.0 }
 0x5eb   :  { %502 = vadd.xlane.f32.xlu1 %v501_v1  ;;  %v494_v3 = vpop.xlane.xlu2 %493 }
 0x5ec   :  { %v496_v48 = vmul.f32 %v494_v3, %v1569_v10 }
 0x5ee   :  { %v498_v4 = vsub.f32 %v488_v59, %v496_v48 }
 0x5f0   :  { %v500_v5 = vmul.f32 %v498_v4, %v498_v4 }
 0x5f2   :  { %v504_v7 = vsel %vm38_vm0, %v500_v5, 0.0 }
 0x5f3   :  { %505 = vadd.xlane.f32.xlu0 %v504_v7 }
 0x65e   :  { %v503_v14 = vpop.xlane.xlu1 %502 }
 0x65f   :  { %v507_v15 = vmul.f32 %v503_v14, %v1569_v10 }
 0x661   :  { %v509_v16 = vadd.f32 1e-12, %v507_v15  ;;  %v599_v15 = vperm.slane %v1585_v54, 5 }
 0x663   :  { %1435 = vrsqrt.f32 %v509_v16  ;;  %vm517_vm14 = vweird.f32 %v509_v16 }
 0x666   :  { %v506_v17 = vpop.xlane.xlu0 %505 }
 0x667   :  { %v508_v18 = vmul.f32 %v506_v17, %v1569_v10 }
 0x669   :  { %v1436_v19 = vpop.eup %1435  ;;  %v510_v20 = vadd.f32 1e-12, %v508_v18 }
 0x66a   :  { %v512_v21 = vmul.f32 %v1436_v19, %v509_v16  ;;  %vm518_vm13 = vweird.f32 %v1436_v19 }
 0x66b   :  { %1437 = vrsqrt.f32 %v510_v20  ;;  %vm519_vm15 = vmor %vm517_vm14, %vm518_vm13  ;;  %vm527_vm2 = vweird.f32 %v510_v20 }
 0x66c   :  { %v513_v23 = vmul.f32 %v1436_v19, %v512_v21 }
 0x66e   :  { %v514_v24 = vmul.f32 0.5, %v513_v23 }
 0x670   :  { %v515_v25 = vsub.f32 1.5, %v514_v24 }
 0x671   :  { %v1438_v26 = vpop.eup %1437 }
 0x672   :  { %v516_v28 = vmul.f32 %v1436_v19, %v515_v25  ;;  %v522_v29 = vmul.f32 %v1438_v26, %v510_v20  ;;  %vm528_vm1 = vweird.f32 %v1438_v26 }
 0x673   :  { %vm529_vm3 = vmor %vm527_vm2, %vm528_vm1 }
 0x674   :  { %v520_v31 = vsel %vm519_vm15, %v1436_v19, %v516_v28  ;;  %v523_v32 = vmul.f32 %v1438_v26, %v522_v29 }
 0x675   :  { %v531_v33 = vmul.f32 %v520_v31, %v497_v63 }
 0x676   :  { %v524_v36 = vmul.f32 0.5, %v523_v32 }
 0x677   :  { %v534_v38 = vmul.f32 %v533_v30, %v531_v33 }
 0x678   :  { %v525_v22 = vsub.f32 1.5, %v524_v36 }
 0x679   :  { %v537_v37 = vadd.f32 %v536_v34, %v534_v38  ;;  %v686_v38 = vld [vmem:[#allocation2 + $0xc8] sm:$0xff] }
 0x67a   :  { %v526_v39 = vmul.f32 %v1438_v26, %v525_v22  ;;  %706 = vmatpush.msra.mxu2 %v686_v38  ;;  %v685_v22 = vld [vmem:[#allocation2 + $0xc0] sm:$0xff] }
 0x67b   :  { %1363 = vmatmul.msk.f32.vlgmr.msra.gmra.mxu0 %vm38_vm0, %v537_v37 }
 0x67c   :  { %v530_v40 = vsel %vm529_vm3, %v1438_v26, %v526_v39  ;;  %707 = vmatpush.msra.mxu2 %v685_v22  ;;  %v683_v39 = vld [vmem:[#allocation2 + $0xb0] sm:$0xff] }
 0x67d   :  { %v532_v41 = vmul.f32 %v530_v40, %v498_v4 }
 0x67f   :  { %v535_v35 = vmul.f32 %v533_v30, %v532_v41 }
 0x681   :  { %v538_v42 = vadd.f32 %v536_v34, %v535_v35 }
 0x683   :  { %1364 = vmatmul.msk.f32.gmra.mxu0 %vm38_vm0, %v538_v42 }
 0x6f8   :  { %v575_v52 = vpop.f32.mrf.mxu0 }
 0x6f9   :  { %v576_v55 = vadd.f32 %v575_v52, %v551_v51 }
 0x6fb   :  { %v583_v56 = vmul.f32 0.044715, %v576_v55  ;;  %v581_v5 = vmul.f32 0.5, %v576_v55 }
 0x6fd   :  { %v585_v57 = vmul.f32 %v583_v56, %v576_v55 }
 0x6ff   :  { %v587_v58 = vmul.f32 %v585_v57, %v576_v55 }
 0x700   :  { %v578_v59 = vpop.f32.mrf.mxu0 }
 0x701   :  { %v589_v60 = vadd.f32 %v587_v58, %v576_v55  ;;  %v579_v61 = vadd.f32 %v578_v59, %v551_v51  ;;  %v676_v55 = vperm.slane %v1585_v54, 6  ;;  %v679_v59 = vperm.slane %v1585_v54, 7  ;;  %v1732_v54 = vld [vmem:[#allocation2 + $0xd0] sm:$0xff] }
 0x703   :  { %v591_v62 = vmul.f32 0.7978846, %v589_v60  ;;  %v584_v63 = vmul.f32 0.044715, %v579_v61  ;;  %v582_v9 = vmul.f32 0.5, %v579_v61 }
 0x705   :  { %1439 = vtanh.f32 %v591_v62  ;;  %v586_v0 = vmul.f32 %v584_v63, %v579_v61 }
 0x707   :  { %v588_v1 = vmul.f32 %v586_v0, %v579_v61 }
 0x709   :  { %v590_v3 = vadd.f32 %v588_v1, %v579_v61 }
 0x70b   :  { %v1440_v48 = vpop.eup %1439  ;;  %v592_v4 = vmul.f32 0.7978846, %v590_v3 }
 0x70c   :  { %v595_v7 = vadd.f32 1.0, %v1440_v48 }
 0x70d   :  { %1441 = vtanh.f32 %v592_v4 }
 0x70e   :  { %v597_v53 = vmul.f32 %v595_v7, %v581_v5  ;;  %v687_v5 = vperm.slane %v1732_v54, 0 }
 0x710   :  { %1365 = vmatmul.msk.f32.vlgmr.msrb.gmra.mxu1 %vm600_vm4, %v597_v53 }
 0x713   :  { %v1442_v8 = vpop.eup %1441 }
 0x714   :  { %v596_v12 = vadd.f32 1.0, %v1442_v8 }
 0x716   :  { %v598_v14 = vmul.f32 %v596_v12, %v582_v9 }
 0x718   :  { %1366 = vmatmul.msk.f32.gmra.mxu1 %vm600_vm4, %v598_v14 }
 0x78d   :  { %v624_v16 = vpop.f32.mrf.mxu1 }
 0x78e   :  { %v625_v17 = vadd.f32 %v624_v16, %v599_v15 }
 0x790   :  { %v630_v18 = vadd.f32 %v625_v17, %v537_v37  ;;  %v684_v37 = vld [vmem:[#allocation2 + $0xb8] sm:$0xff] }
 0x791   :  { %708 = vmatpush.msra.mxu2 %v684_v37 }
 0x792   :  { %v632_v19 = vsel %vm38_vm0, %v630_v18, 0.0 }
 0x793   :  { %633 = vadd.xlane.f32.xlu2 %v632_v19  ;;  %709 = vmatpush.msra.mxu2 %v683_v39 }
 0x795   :  { %v627_v20 = vpop.f32.mrf.mxu1 }
 0x796   :  { %v628_v21 = vadd.f32 %v627_v20, %v599_v15 }
 0x798   :  { %v631_v23 = vadd.f32 %v628_v21, %v538_v42 }
 0x79a   :  { %v635_v24 = vsel %vm38_vm0, %v631_v23, 0.0 }
 0x79b   :  { %636 = vadd.xlane.f32.xlu0 %v635_v24 }
 0x806   :  { %v634_v25 = vpop.xlane.xlu2 %633 }
 0x807   :  { %v638_v26 = vmul.f32 %v634_v25, %v1569_v10 }
 0x809   :  { %v640_v28 = vsub.f32 %v630_v18, %v638_v26 }
 0x80b   :  { %v642_v29 = vmul.f32 %v640_v28, %v640_v28 }
 0x80d   :  { %v644_v30 = vsel %vm38_vm0, %v642_v29, 0.0 }
 0x80e   :  { %v637_v31 = vpop.xlane.xlu0 %636  ;;  %645 = vadd.xlane.f32.xlu1 %v644_v30 }
 0x80f   :  { %v639_v32 = vmul.f32 %v637_v31, %v1569_v10 }
 0x811   :  { %v641_v33 = vsub.f32 %v631_v23, %v639_v32 }
 0x813   :  { %v643_v34 = vmul.f32 %v641_v33, %v641_v33 }
 0x815   :  { %v647_v36 = vsel %vm38_vm0, %v643_v34, 0.0 }
 0x816   :  { %648 = vadd.xlane.f32.xlu2 %v647_v36 }
 0x881   :  { %v646_v40 = vpop.xlane.xlu1 %645 }
 0x882   :  { %v650_v41 = vmul.f32 %v646_v40, %v1569_v10 }
 0x884   :  { %v652_v35 = vadd.f32 1e-12, %v650_v41 }
 0x886   :  { %1443 = vrsqrt.f32 %v652_v35  ;;  %vm660_vm6 = vweird.f32 %v652_v35 }
 0x889   :  { %v649_v42 = vpop.xlane.xlu2 %648 }
 0x88a   :  { %v651_v43 = vmul.f32 %v649_v42, %v1569_v10 }
 0x88c   :  { %v1444_v44 = vpop.eup %1443  ;;  %v653_v45 = vadd.f32 1e-12, %v651_v43 }
 0x88d   :  { %v655_v27 = vmul.f32 %v1444_v44, %v652_v35  ;;  %vm661_vm5 = vweird.f32 %v1444_v44 }
 0x88e   :  { %1445 = vrsqrt.f32 %v653_v45  ;;  %vm662_vm7 = vmor %vm660_vm6, %vm661_vm5  ;;  %vm670_vm11 = vweird.f32 %v653_v45 }
 0x88f   :  { %v656_v46 = vmul.f32 %v1444_v44, %v655_v27 }
 0x891   :  { %v657_v47 = vmul.f32 0.5, %v656_v46 }
 0x893   :  { %v658_v49 = vsub.f32 1.5, %v657_v47 }
 0x894   :  { %v1446_v50 = vpop.eup %1445 }
 0x895   :  { %v659_v51 = vmul.f32 %v1444_v44, %v658_v49  ;;  %v665_v52 = vmul.f32 %v1446_v50, %v653_v45  ;;  %vm671_vm10 = vweird.f32 %v1446_v50 }
 0x896   :  { %vm672_vm12 = vmor %vm670_vm11, %vm671_vm10 }
 0x897   :  { %v663_v56 = vsel %vm662_vm7, %v1444_v44, %v659_v51  ;;  %v666_v57 = vmul.f32 %v1446_v50, %v665_v52 }
 0x898   :  { %v674_v58 = vmul.f32 %v663_v56, %v640_v28 }
 0x899   :  { %v667_v60 = vmul.f32 0.5, %v666_v57 }
 0x89a   :  { %v677_v61 = vmul.f32 %v676_v55, %v674_v58 }
 0x89b   :  { %v668_v62 = vsub.f32 1.5, %v667_v60 }
 0x89c   :  { %v1724_v63 = vadd.f32 %v679_v59, %v677_v61 }
 0x89d   :  { %v669_v0 = vmul.f32 %v1446_v50, %v668_v62 }
 0x89e   :  { %1367 = vmatmul.msk.f32.vlgmr.msra.gmra.mxu2 %vm38_vm0, %v1724_v63 }
 0x89f   :  { %v673_v1 = vsel %vm672_vm12, %v1446_v50, %v669_v0 }
 0x8a0   :  { %v675_v3 = vmul.f32 %v673_v1, %v641_v33 }
 0x8a2   :  { %v678_v48 = vmul.f32 %v676_v55, %v675_v3 }
 0x8a4   :  { %v1728_v4 = vadd.f32 %v679_v59, %v678_v48 }
 0x8a6   :  { %1368 = vmatmul.msk.f32.gmra.mxu2 %vm38_vm0, %v1728_v4 }
 0x921   :  { %v711_v7 = vpop.f32.mrf.mxu2 }
 0x922   :  { %v1735_v53 = vadd.f32 %v711_v7, %v687_v5 }
 0x924   :  { %723 = vrot.lane.b32.xlu2 %v1735_v53, %s1533_s0  ;;  %718 = vrot.lane.b32.xlu1 %v1735_v53, %s1534_s2 }
 0x929   :  { %v714_v8 = vpop.f32.mrf.mxu2 }
 0x92a   :  { %v1741_v9 = vadd.f32 %v714_v8, %v687_v5 }
 0x92c   :  { %721 = vrot.lane.b32.xlu0 %v1741_v9, %s1534_s2  ;;  %v1408_v52 = vpack.i.bf16 %v1741_v9, %v1735_v53 }
 0x97e   :  { %v724_v12 = vpop.permute.xlu2 %723 }
 0x97f   :  { %1369 = vmatpush.xpose.msk.msrb.mxu3 %vm139_vm8, %v724_v12 }
 0x982   :  { %1370 = vmatmul.msk.f32.vlgmr.msrb.gmra.mxu3 %vm139_vm8, %v1735_v53 }
 0x996   :  { %v719_v14 = vpop.permute.xlu1 %718 }
 0x997   :  { %749 = vrot.lane.b32.xlu1 %v719_v14, %s1533_s0 }
 0x99e   :  { %v722_v15 = vpop.permute.xlu0 %721 }
 0x99f   :  { %801 = vrot.lane.b32.xlu0 %v722_v15, %s1533_s0  ;;  %v1403_v32 = vpack.i.bf16 %v722_v15, %v719_v14 }
 0x9a7   :  { %775 = vrot.lane.b32.xlu0 %v1741_v9, %s1533_s0 }
 0xa05   :  { %v746_v16 = vpop.f32.mrf.mxu3 }
 0xa06   :  { %v747_v17 = vadd.f32 %v746_v16, %v1619_v2 }
 0xa08   :  { %v827_v18 = vsel %vm242_vm9, %v747_v17, -inf }
 0xa09   :  { %v750_v19 = vpop.permute.xlu1 %749  ;;  %828 = vmax.xlane.f32.xlu0 %v827_v18 }
 0xa0a   :  { %1371 = vmatpush.xpose.msk.msrb.mxu0 %vm139_vm8, %v750_v19 }
 0xa0d   :  { %1372 = vmatmul.msk.f32.vlgmr.msrb.gmra.mxu0 %vm139_vm8, %v719_v14 }
 0xa11   :  { %v802_v20 = vpop.permute.xlu0 %801 }
 0xa12   :  { %1375 = vmatpush.xpose.msk.msra.mxu3 %vm139_vm8, %v802_v20 }
 0xa15   :  { %1376 = vmatmul.msk.f32.vlgmr.msra.gmra.mxu3 %vm139_vm8, %v722_v15 }
 0xa19   :  { %v776_v21 = vpop.permute.xlu0 %775 }
 0xa1a   :  { %1373 = vmatpush.xpose.msk.msrb.mxu2 %vm139_vm8, %v776_v21 }
 0xa1d   :  { %1374 = vmatmul.msk.f32.vlgmr.msrb.gmra.mxu2 %vm139_vm8, %v1741_v9 }
 0xa7c   :  { %v829_v33 = vpop.xlane.xlu0 %828 }
 0xa7d   :  { %v839_v36 = vsub.f32 %v747_v17, %v829_v33 }
 0xa7f   :  { %v843_v22 = vmul.f32 1.442695, %v839_v36 }
 0xa8a   :  { %v772_v2 = vpop.f32.mrf.mxu0 }
 0xa8b   :  { %v773_v23 = vadd.f32 %v772_v2, %v1638_v13 }
 0xa8d   :  { %v830_v24 = vsel %vm242_vm9, %v773_v23, -inf }
 0xa8e   :  { %831 = vmax.xlane.f32.xlu2 %v830_v24 }
 0xa98   :  { %v824_v25 = vpop.f32.mrf.mxu3 }
 0xa99   :  { %v825_v26 = vadd.f32 %v824_v25, %v1626_v6 }
 0xa9b   :  { %v836_v28 = vsel %vm242_vm9, %v825_v26, -inf }
 0xa9c   :  { %837 = vmax.xlane.f32.xlu1 %v836_v28 }
 0xaa0   :  { %v798_v29 = vpop.f32.mrf.mxu2 }
 0xaa1   :  { %v799_v30 = vadd.f32 %v798_v29, %v1633_v11 }
 0xaa3   :  { %v833_v31 = vsel %vm242_vm9, %v799_v30, -inf }
 0xaa4   :  { %834 = vmax.xlane.f32.xlu2 %v833_v31 }
 0xabc   :  { %1404 = vrot.lane.b32.xlu2 %v1403_v32, %s1535_s1 }
 0xb01   :  { %v832_v13 = vpop.xlane.xlu2 %831 }
 0xb02   :  { %v840_v34 = vsub.f32 %v773_v23, %v832_v13 }
 0xb04   :  { %v845_v38 = vmul.f32 1.442695, %v840_v34 }
 0xb06   :  { %1447 = vpow2.f32 %v845_v38 }
 0xb07   :  { %1449 = vpow2.f32 %v843_v22 }
 0xb0c   :  { %v1448_v6 = vpop.eup %1447 }
 0xb0d   :  { %v854_v37 = vsel %vm242_vm9, %v1448_v6, 0.0  ;;  %v1769_v40 = vpop.eup %1449 }
 0xb0e   :  { %855 = vadd.xlane.f32.xlu1 %v854_v37  ;;  %v851_v35 = vsel %vm242_vm9, %v1769_v40, 0.0 }
 0xb0f   :  { %v838_v39 = vpop.xlane.xlu1 %837 }
 0xb10   :  { %v842_v11 = vsub.f32 %v825_v26, %v838_v39 }
 0xb12   :  { %v849_v41 = vmul.f32 1.442695, %v842_v11 }
 0xb14   :  { %1451 = vpow2.f32 %v849_v41 }
 0xb16   :  { %852 = vadd.xlane.f32.xlu1 %v851_v35 }
 0xb17   :  { %v835_v42 = vpop.xlane.xlu2 %834 }
 0xb18   :  { %v841_v43 = vsub.f32 %v799_v30, %v835_v42 }
 0xb1a   :  { %v1773_v44 = vpop.eup %1451  ;;  %v847_v45 = vmul.f32 1.442695, %v841_v43 }
 0xb1b   :  { %v860_v27 = vsel %vm242_vm9, %v1773_v44, 0.0 }
 0xb1c   :  { %1453 = vpow2.f32 %v847_v45  ;;  %861 = vadd.xlane.f32.xlu0 %v860_v27  ;;  %v1040_v45 = vld [vmem:[#allocation2 + $0xf0] sm:$0xff] }
 0xb1f   :  { %v1405_v46 = vpop.permute.xlu2 %1404 }
 0xb20   :  { %v1407_v47 = vunpack.i.h.bf16 %v1405_v46  ;;  %v1406_v49 = vunpack.i.l.bf16 %v1405_v46  ;;  %v1039_v46 = vld [vmem:[#allocation2 + $0xe8] sm:$0xff] }
 0xb22   :  { %v1777_v50 = vpop.eup %1453  ;;  %970 = vmatpush.msra.mxu1 %v1406_v49  ;;  %1022 = vmatpush.msrb.mxu3 %v1407_v47  ;;  %v1038_v47 = vld [vmem:[#allocation2 + $0xe0] sm:$0xff]  ;;  %v1037_v49 = vld [vmem:[#allocation2 + $0xd8] sm:$0xff] }
 0xb23   :  { %v857_v51 = vsel %vm242_vm9, %v1777_v50, 0.0 }
 0xb24   :  { %858 = vadd.xlane.f32.xlu0 %v857_v51 }
 0xb2f   :  { %1409 = vrot.lane.b32.xlu1 %v1408_v52, %s1535_s1 }
 0xb81   :  { %v856_v55 = vpop.xlane.xlu1 %855 }
 0xb82   :  { %1455 = vrcp.f32 %v856_v55  ;;  %v889_v60 = vand.u32 2147483648, %v856_v55  ;;  %v887_v62 = vand.u32 2147483647, %v856_v55  ;;  %vm883_vm14 = vweird.f32 %v856_v55 }
 0xb84   :  { %v890_v48 = vor.u32 1.1754944e-38, %v889_v60  ;;  %vm888_vm1 = vcmp.eq.f32.partialorder %v887_v62, 8.507059e+37 }
 0xb88   :  { %v1456_v56 = vpop.eup %1455 }
 0xb89   :  { %v879_v57 = vmul.f32 %v1456_v56, %v856_v55  ;;  %v853_v58 = vpop.xlane.xlu1 %852  ;;  %vm884_vm13 = vweird.f32 %v1456_v56 }
 0xb8a   :  { %1457 = vrcp.f32 %v853_v58  ;;  %vm885_vm15 = vmor %vm883_vm14, %vm884_vm13  ;;  %vm868_vm3 = vweird.f32 %v853_v58  ;;  %v874_v19 = vand.u32 2147483648, %v853_v58  ;;  %v872_v21 = vand.u32 2147483647, %v853_v58 }
 0xb8b   :  { %v880_v59 = vsub.f32 1.0, %v879_v57 }
 0xb8c   :  { %v875_v28 = vor.u32 1.1754944e-38, %v874_v19  ;;  %vm873_vm11 = vcmp.eq.f32.partialorder %v872_v21, 8.507059e+37  ;;  %v1123_v19 = vld [vmem:[#allocation2 + $0xf8] sm:$0xff] }
 0xb8d   :  { %v881_v61 = vmul.f32 %v1456_v56, %v880_v59 }
 0xb8f   :  { %v882_v0 = vadd.f32 %v1456_v56, %v881_v61  ;;  %v862_v1 = vpop.xlane.xlu0 %861 }
 0xb90   :  { %v1458_v3 = vpop.eup %1457  ;;  %1459 = vrcp.f32 %v862_v1  ;;  %v919_v20 = vand.u32 2147483648, %v862_v1  ;;  %v917_v23 = vand.u32 2147483647, %v862_v1  ;;  %vm913_vm7 = vweird.f32 %v862_v1 }
 0xb91   :  { %v886_v5 = vsel %vm885_vm15, %v1456_v56, %v882_v0  ;;  %v864_v7 = vmul.f32 %v1458_v3, %v853_v58  ;;  %vm869_vm2 = vweird.f32 %v1458_v3  ;;  %v1041_v58 = vperm.slane %v1732_v54, 1 }
 0xb92   :  { %v891_v53 = vsel %vm888_vm1, %v890_v48, %v886_v5  ;;  %vm870_vm6 = vmor %vm868_vm3, %vm869_vm2  ;;  %v920_v29 = vor.u32 1.1754944e-38, %v919_v20  ;;  %vm918_vm12 = vcmp.eq.f32.partialorder %v917_v23, 8.507059e+37 }
 0xb93   :  { %v865_v8 = vsub.f32 1.0, %v864_v7  ;;  %v892_v9 = vmul.f32 %v1448_v6, %v891_v53 }
 0xb95   :  { %v866_v12 = vmul.f32 %v1458_v3, %v865_v8  ;;  %1378 = vmatmul.msk.f32.vlgmr.msra.gmra.mxu1 %vm242_vm9, %v892_v9 }
 0xb96   :  { %v1460_v14 = vpop.eup %1459 }
 0xb97   :  { %v909_v15 = vmul.f32 %v1460_v14, %v862_v1  ;;  %v859_v16 = vpop.xlane.xlu0 %858  ;;  %v867_v17 = vadd.f32 %v1458_v3, %v866_v12  ;;  %vm914_vm5 = vweird.f32 %v1460_v14 }
 0xb98   :  { %1461 = vrcp.f32 %v859_v16  ;;  %vm915_vm10 = vmor %vm913_vm7, %vm914_vm5  ;;  %v904_v38 = vand.u32 2147483648, %v859_v16  ;;  %v902_v39 = vand.u32 2147483647, %v859_v16  ;;  %vm898_vm14 = vweird.f32 %v859_v16 }
 0xb99   :  { %v910_v18 = vsub.f32 1.0, %v909_v15  ;;  %v871_v24 = vsel %vm870_vm6, %v1458_v3, %v867_v17  ;;  %v1125_v17 = vld [vmem:[#allocation2 + $0x108] sm:$0xff] }
 0xb9a   :  { %v876_v32 = vsel %vm873_vm11, %v875_v28, %v871_v24  ;;  %v905_v35 = vor.u32 1.1754944e-38, %v904_v38  ;;  %vm903_vm1 = vcmp.eq.f32.partialorder %v902_v39, 8.507059e+37 }
 0xb9b   :  { %v911_v2 = vmul.f32 %v1460_v14, %v910_v18  ;;  %v877_v11 = vmul.f32 %v1769_v40, %v876_v32  ;;  %v1124_v18 = vld [vmem:[#allocation2 + $0x100] sm:$0xff] }
 0xb9d   :  { %v912_v25 = vadd.f32 %v1460_v14, %v911_v2 }
 0xb9e   :  { %v1462_v26 = vpop.eup %1461 }
 0xb9f   :  { %v916_v30 = vsel %vm915_vm10, %v1460_v14, %v912_v25  ;;  %v894_v31 = vmul.f32 %v1462_v26, %v859_v16  ;;  %vm899_vm13 = vweird.f32 %v1462_v26 }
 0xba0   :  { %v921_v33 = vsel %vm918_vm12, %v920_v29, %v916_v30  ;;  %vm900_vm15 = vmor %vm898_vm14, %vm899_vm13  ;;  %vm1268_vm14 = vcmask 1040384  }
 0xba1   :  { %v895_v13 = vsub.f32 1.0, %v894_v31  ;;  %v1410_v34 = vpop.permute.xlu1 %1409  ;;  %v922_v36 = vmul.f32 %v1773_v44, %v921_v33 }
 0xba2   :  { %v1412_v22 = vunpack.i.h.bf16 %v1410_v34  ;;  %v1411_v6 = vunpack.i.l.bf16 %v1410_v34  ;;  %v1117_v34 = vperm.slane %v1732_v54, 2 }
 0xba3   :  { %v896_v37 = vmul.f32 %v1462_v26, %v895_v13  ;;  %1380 = vmatmul.msk.f32.vlgmr.msrb.gmra.mxu3 %vm242_vm9, %v922_v36 }
 0xba4   :  { %944 = vmatpush.msra.mxu0 %v1411_v6  ;;  %996 = vmatpush.msra.mxu2 %v1412_v22  ;;  %v1120_v6 = vperm.slane %v1732_v54, 3 }
 0xba5   :  { %v897_v41 = vadd.f32 %v1462_v26, %v896_v37  ;;  %1377 = vmatmul.msk.f32.vlgmr.msra.gmra.mxu0 %vm242_vm9, %v877_v11 }
 0xba6   :  { %1060 = vmatpush.msrb.mxu0 %v1040_v45 }
 0xba7   :  { %v901_v42 = vsel %vm900_vm15, %v1462_v26, %v897_v41  ;;  %vm1328_vm15 = vcmask 9216  }
 0xba8   :  { %v906_v43 = vsel %vm903_vm1, %v905_v35, %v901_v42  ;;  %1061 = vmatpush.msrb.mxu0 %v1039_v46  ;;  %v1132_v46 = vld [vmem:[#allocation2 + $0x140] sm:$0xff] }
 0xba9   :  { %v907_v44 = vmul.f32 %v1777_v50, %v906_v43 }
 0xbaa   :  { %1062 = vmatpush.msrb.mxu0 %v1038_v47  ;;  %v1131_v47 = vld [vmem:[#allocation2 + $0x138] sm:$0xff] }
 0xbab   :  { %1379 = vmatmul.msk.f32.vlgmr.msra.gmra.mxu2 %vm242_vm9, %v907_v44 }
 0xbac   :  { %1063 = vmatpush.msrb.mxu0 %v1037_v49  ;;  %v1130_v49 = vld [vmem:[#allocation2 + $0x130] sm:$0xff] }
 0xc12   :  { %v972_v27 = vpop.f32.mrf.mxu1 }
 0xc13   :  { %1028 = vrot.lane.b32.xlu0 %v972_v27, %s1536_s4  ;;  %v1134_v27 = vld [vmem:[#allocation2 + $0x150] sm:$0xff] }
 0xc14   :  { %1198 = vmatpush.msrb.mxu2 %v1134_v27 }
 0xc22   :  { %v946_v51 = vpop.f32.mrf.mxu0 }
 0xc26   :  { %v1024_v40 = vpop.f32.mrf.mxu3 }
 0xc27   :  { %1033 = vrot.lane.b32.xlu2 %v1024_v40, %s1536_s4  ;;  %v1133_v40 = vld [vmem:[#allocation2 + $0x148] sm:$0xff] }
 0xc28   :  { %1199 = vmatpush.msrb.mxu2 %v1133_v40 }
 0xc2a   :  { %1200 = vmatpush.msrb.mxu2 %v1132_v46 }
 0xc2c   :  { %1201 = vmatpush.msrb.mxu2 %v1131_v47 }
 0xc2e   :  { %v998_v56 = vpop.f32.mrf.mxu2  ;;  %1202 = vmatpush.msrb.mxu2 %v1130_v49 }
 0xc81   :  { %v1034_v55 = vpop.permute.xlu2 %1033 }
 0xc82   :  { %v1036_v57 = vsel %vm139_vm8, %v998_v56, %v1034_v55  ;;  %v1135_v55 = vperm.slane %v1732_v54, 4 }
 0xc85   :  { %v1029_v52 = vpop.permute.xlu0 %1028 }
 0xc86   :  { %v1031_v50 = vsel %vm139_vm8, %v946_v51, %v1029_v52  ;;  %v1129_v51 = vld [vmem:[#allocation2 + $0x128] sm:$0xff]  ;;  %v1128_v52 = vld [vmem:[#allocation2 + $0x120] sm:$0xff] }
 0xc87   :  { %1381 = vmatmul.msk.f32.vlgmr.msrb.gmra.mxu0 %vm38_vm0, %v1031_v50  ;;  %1203 = vmatpush.msrb.mxu2 %v1129_v51  ;;  %v1127_v50 = vld [vmem:[#allocation2 + $0x118] sm:$0xff] }
 0xc89   :  { %1204 = vmatpush.msrb.mxu2 %v1128_v52 }
 0xc8b   :  { %1205 = vmatpush.msrb.mxu2 %v1127_v50 }
 0xc8f   :  { %1382 = vmatmul.msk.f32.gmra.mxu0 %vm38_vm0, %v1036_v57 }
 0xd04   :  { %v1065_v59 = vpop.f32.mrf.mxu0 }
 0xd05   :  { %v1066_v60 = vadd.f32 %v1065_v59, %v1041_v58 }
 0xd07   :  { %v1071_v61 = vadd.f32 %v1066_v60, %v1724_v63 }
 0xd09   :  { %v1073_v62 = vsel %vm38_vm0, %v1071_v61, 0.0 }
 0xd0a   :  { %1074 = vadd.xlane.f32.xlu2 %v1073_v62 }
 0xd0c   :  { %v1068_v0 = vpop.f32.mrf.mxu0 }
 0xd0d   :  { %v1069_v1 = vadd.f32 %v1068_v0, %v1041_v58 }
 0xd0f   :  { %v1072_v3 = vadd.f32 %v1069_v1, %v1728_v4  ;;  %v1126_v4 = vld [vmem:[#allocation2 + $0x110] sm:$0xff] }
 0xd10   :  { %1154 = vmatpush.msrb.mxu1 %v1126_v4 }
 0xd11   :  { %v1076_v48 = vsel %vm38_vm0, %v1072_v3, 0.0 }
 0xd12   :  { %1077 = vadd.xlane.f32.xlu0 %v1076_v48  ;;  %1155 = vmatpush.msrb.mxu1 %v1125_v17  ;;  %v1183_v17 = vperm.slane %v1732_v54, 5 }
 0xd14   :  { %1156 = vmatpush.msrb.mxu1 %v1124_v18 }
 0xd16   :  { %1157 = vmatpush.msrb.mxu1 %v1123_v19 }
 0xd7d   :  { %v1075_v5 = vpop.xlane.xlu2 %1074 }
 0xd7e   :  { %v1079_v7 = vmul.f32 %v1075_v5, %v1569_v10 }
 0xd80   :  { %v1081_v53 = vsub.f32 %v1071_v61, %v1079_v7 }
 0xd82   :  { %v1083_v8 = vmul.f32 %v1081_v53, %v1081_v53 }
 0xd84   :  { %v1085_v9 = vsel %vm38_vm0, %v1083_v8, 0.0 }
 0xd85   :  { %v1078_v12 = vpop.xlane.xlu0 %1077  ;;  %1086 = vadd.xlane.f32.xlu1 %v1085_v9 }
 0xd86   :  { %v1080_v63 = vmul.f32 %v1078_v12, %v1569_v10 }
 0xd88   :  { %v1082_v14 = vsub.f32 %v1072_v3, %v1080_v63 }
 0xd8a   :  { %v1084_v15 = vmul.f32 %v1082_v14, %v1082_v14 }
 0xd8c   :  { %v1088_v16 = vsel %vm38_vm0, %v1084_v15, 0.0 }
 0xd8d   :  { %1089 = vadd.xlane.f32.xlu2 %v1088_v16 }
 0xdf8   :  { %v1087_v20 = vpop.xlane.xlu1 %1086 }
 0xdf9   :  { %v1091_v21 = vmul.f32 %v1087_v20, %v1569_v10 }
 0xdfb   :  { %v1093_v2 = vadd.f32 1e-12, %v1091_v21 }
 0xdfd   :  { %1463 = vrsqrt.f32 %v1093_v2  ;;  %vm1101_vm9 = vweird.f32 %v1093_v2 }
 0xe00   :  { %v1090_v23 = vpop.xlane.xlu2 %1089 }
 0xe01   :  { %v1092_v24 = vmul.f32 %v1090_v23, %v1569_v10 }
 0xe03   :  { %v1464_v25 = vpop.eup %1463  ;;  %v1094_v26 = vadd.f32 1e-12, %v1092_v24 }
 0xe04   :  { %v1096_v28 = vmul.f32 %v1464_v25, %v1093_v2  ;;  %vm1102_vm8 = vweird.f32 %v1464_v25 }
 0xe05   :  { %1465 = vrsqrt.f32 %v1094_v26  ;;  %vm1103_vm2 = vmor %vm1101_vm9, %vm1102_vm8  ;;  %vm1111_vm5 = vweird.f32 %v1094_v26 }
 0xe06   :  { %v1097_v29 = vmul.f32 %v1464_v25, %v1096_v28 }
 0xe08   :  { %v1098_v30 = vmul.f32 0.5, %v1097_v29 }
 0xe0a   :  { %v1099_v31 = vsub.f32 1.5, %v1098_v30 }
 0xe0b   :  { %v1466_v32 = vpop.eup %1465 }
 0xe0c   :  { %v1100_v33 = vmul.f32 %v1464_v25, %v1099_v31  ;;  %v1106_v13 = vmul.f32 %v1466_v32, %v1094_v26  ;;  %vm1112_vm3 = vweird.f32 %v1466_v32 }
 0xe0d   :  { %vm1113_vm6 = vmor %vm1111_vm5, %vm1112_vm3 }
 0xe0e   :  { %v1104_v36 = vsel %vm1103_vm2, %v1464_v25, %v1100_v33  ;;  %v1107_v38 = vmul.f32 %v1466_v32, %v1106_v13 }
 0xe0f   :  { %v1115_v22 = vmul.f32 %v1104_v36, %v1081_v53 }
 0xe10   :  { %v1108_v37 = vmul.f32 0.5, %v1107_v38 }
 0xe11   :  { %v1118_v39 = vmul.f32 %v1117_v34, %v1115_v22 }
 0xe12   :  { %v1109_v11 = vsub.f32 1.5, %v1108_v37  ;;  %v1273_v37 = vld [vmem:[#allocation2 + $0x168] sm:$0xff] }
 0xe13   :  { %v1121_v41 = vadd.f32 %v1120_v6, %v1118_v39 }
 0xe14   :  { %v1110_v35 = vmul.f32 %v1466_v32, %v1109_v11  ;;  %v1272_v11 = vld [vmem:[#allocation2 + $0x160] sm:$0xff] }
 0xe15   :  { %1383 = vmatmul.msk.f32.vlgmr.msrb.gmra.mxu1 %vm38_vm0, %v1121_v41 }
 0xe16   :  { %v1114_v42 = vsel %vm1113_vm6, %v1466_v32, %v1110_v35 }
 0xe17   :  { %v1116_v43 = vmul.f32 %v1114_v42, %v1082_v14 }
 0xe19   :  { %v1119_v44 = vmul.f32 %v1117_v34, %v1116_v43 }
 0xe1b   :  { %v1122_v45 = vadd.f32 %v1120_v6, %v1119_v44  ;;  %v1274_v6 = vld [vmem:[#allocation2 + $0x170] sm:$0xff] }
 0xe1c   :  { %1291 = vmatpush.msra.mxu3 %v1274_v6 }
 0xe1d   :  { %1384 = vmatmul.msk.f32.gmra.mxu1 %vm38_vm0, %v1122_v45 }
 0xe1e   :  { %1292 = vmatpush.msra.mxu3 %v1273_v37 }
 0xe20   :  { %1293 = vmatpush.msra.mxu3 %v1272_v11 }
 0xe92   :  { %v1159_v56 = vpop.f32.mrf.mxu1 }
 0xe93   :  { %v1160_v57 = vadd.f32 %v1159_v56, %v1135_v55 }
 0xe95   :  { %v1167_v58 = vmul.f32 0.044715, %v1160_v57  ;;  %v1165_v9 = vmul.f32 0.5, %v1160_v57 }
 0xe97   :  { %v1169_v59 = vmul.f32 %v1167_v58, %v1160_v57 }
 0xe99   :  { %v1171_v60 = vmul.f32 %v1169_v59, %v1160_v57 }
 0xe9a   :  { %v1162_v61 = vpop.f32.mrf.mxu1 }
 0xe9b   :  { %v1173_v62 = vadd.f32 %v1171_v60, %v1160_v57  ;;  %v1163_v0 = vadd.f32 %v1162_v61, %v1135_v55 }
 0xe9d   :  { %v1175_v1 = vmul.f32 0.7978846, %v1173_v62  ;;  %v1168_v3 = vmul.f32 0.044715, %v1163_v0  ;;  %v1166_v15 = vmul.f32 0.5, %v1163_v0 }
 0xe9f   :  { %1467 = vtanh.f32 %v1175_v1  ;;  %v1170_v48 = vmul.f32 %v1168_v3, %v1163_v0 }
 0xea1   :  { %v1172_v5 = vmul.f32 %v1170_v48, %v1163_v0 }
 0xea3   :  { %v1174_v7 = vadd.f32 %v1172_v5, %v1163_v0  ;;  %v1262_v0 = vperm.slane %v1732_v54, 7 }
 0xea5   :  { %v1468_v53 = vpop.eup %1467  ;;  %v1176_v8 = vmul.f32 0.7978846, %v1174_v7  ;;  %v1303_v7 = vld [vmem:[#allocation2 + $0x190] sm:$0xff] }
 0xea6   :  { %v1179_v12 = vadd.f32 1.0, %v1468_v53  ;;  %v1302_v53 = vld [vmem:[#allocation2 + $0x188] sm:$0xff] }
 0xea7   :  { %1469 = vtanh.f32 %v1176_v8  ;;  %v1301_v8 = vld [vmem:[#allocation2 + $0x180] sm:$0xff] }
 0xea8   :  { %v1181_v63 = vmul.f32 %v1179_v12, %v1165_v9  ;;  %v1300_v9 = vld [vmem:[#allocation2 + $0x178] sm:$0xff] }
 0xea9   :  { %v1270_v12 = vld [vmem:[#allocation2 + $0x198] sm:$0xff] }
 0xeaa   :  { %1385 = vmatmul.msk.f32.vlgmr.msrb.gmra.mxu2 %vm600_vm4, %v1181_v63  ;;  %v1275_v63 = vperm.slane %v1270_v12, 0 }
 0xead   :  { %v1470_v14 = vpop.eup %1469 }
 0xeae   :  { %v1180_v16 = vadd.f32 1.0, %v1470_v14 }
 0xeb0   :  { %v1182_v4 = vmul.f32 %v1180_v16, %v1166_v15  ;;  %v1304_v16 = vperm.slane %v1270_v12, 1 }
 0xeb2   :  { %1386 = vmatmul.msk.f32.gmra.mxu2 %vm600_vm4, %v1182_v4 }
 0xf2d   :  { %v1207_v18 = vpop.f32.mrf.mxu2 }
 0xf2e   :  { %v1208_v19 = vadd.f32 %v1207_v18, %v1183_v17 }
 0xf30   :  { %v1213_v20 = vadd.f32 %v1208_v19, %v1121_v41  ;;  %v1271_v41 = vld [vmem:[#allocation2 + $0x158] sm:$0xff] }
 0xf31   :  { %1294 = vmatpush.msra.mxu3 %v1271_v41 }
 0xf32   :  { %v1215_v21 = vsel %vm38_vm0, %v1213_v20, 0.0 }
 0xf33   :  { %1216 = vadd.xlane.f32.xlu1 %v1215_v21  ;;  %1320 = vmatpush.msrb.mxu3 %v1303_v7 }
 0xf35   :  { %v1210_v2 = vpop.f32.mrf.mxu2  ;;  %1321 = vmatpush.msrb.mxu3 %v1302_v53 }
 0xf36   :  { %v1211_v23 = vadd.f32 %v1210_v2, %v1183_v17 }
 0xf37   :  { %1322 = vmatpush.msrb.mxu3 %v1301_v8 }
 0xf38   :  { %v1214_v24 = vadd.f32 %v1211_v23, %v1122_v45 }
 0xf39   :  { %1323 = vmatpush.msrb.mxu3 %v1300_v9 }
 0xf3a   :  { %v1218_v25 = vsel %vm38_vm0, %v1214_v24, 0.0 }
 0xf3b   :  { %1219 = vadd.xlane.f32.xlu0 %v1218_v25 }
 0xfa6   :  { %v1217_v26 = vpop.xlane.xlu1 %1216 }
 0xfa7   :  { %v1221_v28 = vmul.f32 %v1217_v26, %v1569_v10 }
 0xfa9   :  { %v1223_v29 = vsub.f32 %v1213_v20, %v1221_v28 }
 0xfab   :  { %v1225_v30 = vmul.f32 %v1223_v29, %v1223_v29 }
 0xfad   :  { %v1227_v31 = vsel %vm38_vm0, %v1225_v30, 0.0 }
 0xfae   :  { %1228 = vadd.xlane.f32.xlu0 %v1227_v31  ;;  %v1220_v32 = vpop.xlane.xlu0 %1219 }
 0xfaf   :  { %v1222_v33 = vmul.f32 %v1220_v32, %v1569_v10 }
 0xfb1   :  { %v1224_v13 = vsub.f32 %v1214_v24, %v1222_v33 }
 0xfb3   :  { %v1226_v34 = vmul.f32 %v1224_v13, %v1224_v13 }
 0xfb5   :  { %v1230_v36 = vsel %vm38_vm0, %v1226_v34, 0.0 }
 0xfb6   :  { %1231 = vadd.xlane.f32.xlu2 %v1230_v36 }
0x1021   :  { %v1229_v38 = vpop.xlane.xlu0 %1228 }
0x1022   :  { %v1233_v22 = vmul.f32 %v1229_v38, %v1569_v10 }
0x1024   :  { %v1235_v39 = vadd.f32 1e-12, %v1233_v22 }
0x1026   :  { %1471 = vrsqrt.f32 %v1235_v39  ;;  %vm1243_vm7 = vweird.f32 %v1235_v39 }
0x1029   :  { %v1232_v35 = vpop.xlane.xlu2 %1231 }
0x102a   :  { %v1234_v42 = vmul.f32 %v1232_v35, %v1569_v10  ;;  %v1259_v10 = vperm.slane %v1732_v54, 6 }
0x102c   :  { %v1472_v43 = vpop.eup %1471  ;;  %v1236_v44 = vadd.f32 1e-12, %v1234_v42 }
0x102d   :  { %v1238_v45 = vmul.f32 %v1472_v43, %v1235_v39  ;;  %vm1244_vm4 = vweird.f32 %v1472_v43 }
0x102e   :  { %1473 = vrsqrt.f32 %v1236_v44  ;;  %vm1245_vm10 = vmor %vm1243_vm7, %vm1244_vm4  ;;  %vm1253_vm12 = vweird.f32 %v1236_v44 }
0x102f   :  { %v1239_v27 = vmul.f32 %v1472_v43, %v1238_v45 }
0x1031   :  { %v1240_v40 = vmul.f32 0.5, %v1239_v27 }
0x1033   :  { %v1241_v46 = vsub.f32 1.5, %v1240_v40 }
0x1034   :  { %v1474_v47 = vpop.eup %1473 }
0x1035   :  { %v1248_v49 = vmul.f32 %v1474_v47, %v1236_v44  ;;  %v1242_v51 = vmul.f32 %v1472_v43, %v1241_v46  ;;  %vm1254_vm11 = vweird.f32 %v1474_v47 }
0x1036   :  { %vm1255_vm13 = vmor %vm1253_vm12, %vm1254_vm11 }
0x1037   :  { %v1249_v52 = vmul.f32 %v1474_v47, %v1248_v49  ;;  %v1246_v55 = vsel %vm1245_vm10, %v1472_v43, %v1242_v51 }
0x1038   :  { %v1257_v58 = vmul.f32 %v1246_v55, %v1223_v29 }
0x1039   :  { %v1250_v50 = vmul.f32 0.5, %v1249_v52 }
0x103a   :  { %v1260_v61 = vmul.f32 %v1259_v10, %v1257_v58 }
0x103b   :  { %v1251_v56 = vsub.f32 1.5, %v1250_v50 }
0x103c   :  { %v1263_v3 = vadd.f32 %v1262_v0, %v1260_v61 }
0x103d   :  { %v1252_v57 = vmul.f32 %v1474_v47, %v1251_v56 }
0x103f   :  { %v1256_v59 = vsel %vm1255_vm13, %v1474_v47, %v1252_v57 }
0x1040   :  { %v1258_v60 = vmul.f32 %v1256_v59, %v1224_v13 }
0x1042   :  { %v1261_v62 = vmul.f32 %v1259_v10, %v1258_v60 }
0x1044   :  { %v1264_v1 = vadd.f32 %v1262_v0, %v1261_v62 }
0x1046   :  { %v1266_v48 = vrot.slane %v1264_v1, 7 }
0x1048   :  { %v1269_v5 = vsel %vm1268_vm14, %v1263_v3, %v1266_v48 }
0x1049   :  { %1387 = vmatmul.msk.f32.vlgmr.msra.gmra.mxu3 %vm38_vm0, %v1269_v5 }
0x10cc   :  { %v1296_v14 = vpop.f32.mrf.mxu3 }
0x10cd   :  { %v1297_v15 = vadd.f32 %v1296_v14, %v1275_v63 }
0x10cf   :  { %1475 = vtanh.f32 %v1297_v15 }
0x10d5   :  { %v1476_v54 = vpop.eup %1475 }
0x10d6   :  { %1388 = vmatmul.msk.f32.vlgmr.msrb.gmra.mxu3 %vm38_vm0, %v1476_v54 }
0x1159   :  { %v1325_v4 = vpop.f32.mrf.mxu3 }
0x115a   :  { %v1326_v17 = vadd.f32 %v1325_v4, %v1304_v16 }
0x115c   :  { %1329 = vst.msk [vmem:[#allocation5] sm:$0x3] %vm1328_vm15, %v1326_v17 }
0x115d   :  { %1340 = dma.vmem_to_hbm [thread:$0]  %s1336_s6, 32, %s1338_s9, [#allocation4]  }
0x115e   :  { %1527 = dma.done.wait [#allocation4], 32  }
0x115f   :  { %1528 = vsyncadd [#allocation4], 4294967264 }
0x1160   :  { %1345 = vsyncpa [#allocation3], 1 }
0x1161   :  { %1346 = vsyncpa [#allocation4], 1 }

</bundles_post_ra>
